<compile_context>
chip_gen: v7x
topology: tpu7x:2x2x1
jax: 0.10.0
libtpu: 0.0.40
codegen_flags: <defaults>
</compile_context>

<pallas_src>
import math
from functools import partial

import jax
import jax.numpy as jnp
from jax import lax
from jax.experimental import pallas as pl
from jax.experimental.pallas import tpu as pltpu

SELU_ALPHA = 1.6732632423543772848170429916717
SELU_SCALE = 1.0507009873554804934193349852946
_NEG_INF = -1e9
_PAD_ROWS = 8  # sublane-aligned guard band for the local-conv scratch


# ------------------------- fused encoder kernel -------------------------

def _layer_norm(x, a, b, eps):
    # Matches the module's custom LayerNorm: a*(x-mean)/(std+eps)+b with torch.std (unbiased).
    d = x.shape[-1]
    mean = jnp.mean(x, axis=-1, keepdims=True)
    diff = x - mean
    var = jnp.sum(diff * diff, axis=-1, keepdims=True) / (d - 1)
    inv = 1.0 / (jnp.sqrt(var) + eps)          # one divide per row, then broadcast multiply
    return a * (diff * inv) + b


def _fused_encoder_kernel(
        # ---- inputs (order must match in_specs in the wrapper) ----
        x_ref, pe_ref, mask_ref,
        ln1a_ref, ln1b_ref,
        wq_ref, bq_ref, wk_ref, bk_ref, wv_ref, bv_ref,
        wconv_ref, bconv_ref,
        wo_ref, bo_ref,
        ln2a_ref, ln2b_ref,
        w1_ref, b1_ref, w2_ref, b2_ref,
        fina_ref, finb_ref,
        # ---- output ----
        o_ref,
        # ---- scratch ----
        xres_ref, vpad_ref,
        *, Bt, S, D, H, d_k, K, eps):
    l = pl.program_id(1)
    n_layers = pl.num_programs(1)
    pad = (K - 1) // 2
    inv_sqrt_dk = 1.0 / math.sqrt(d_k)
    BS = Bt * S
    bf = jnp.bfloat16

    @pl.when(l == 0)
    def _seed():
        # residual stream = embeddings + positional encoding (dropout = eval identity)
        xres_ref[...] = x_ref[...] + pe_ref[...]
        # zero ONLY the guard rows of the conv scratch, once per batch block
        # (the data rows [PAD_ROWS, PAD_ROWS+S) are rewritten every layer step).
        zg = jnp.zeros((Bt, _PAD_ROWS, D), jnp.float32)
        vpad_ref[:, pl.ds(0, _PAD_ROWS), :] = zg
        vpad_ref[:, pl.ds(_PAD_ROWS + S, _PAD_ROWS), :] = zg

    x = xres_ref[...]                                          # (Bt, S, D) f32, VMEM-resident

    # additive key-mask bias shared by every head (no per-head selects)
    mask_bias = jnp.where(mask_ref[...] == 0.0, _NEG_INF, 0.0).astype(jnp.float32)  # (Bt,1,S)

    # ---------------- sublayer 0: LN -> multi-head attention + local conv ----------------
    xn = _layer_norm(x, ln1a_ref[...], ln1b_ref[...], eps)
    xn2d = xn.astype(bf).reshape(BS, D)                        # flattened M = Bt*S

    q = jnp.dot(xn2d, wq_ref[...], preferred_element_type=jnp.float32) + bq_ref[...]
    k = jnp.dot(xn2d, wk_ref[...], preferred_element_type=jnp.float32) + bk_ref[...]
    v = jnp.dot(xn2d, wv_ref[...], preferred_element_type=jnp.float32) + bv_ref[...]

    q3 = (q * inv_sqrt_dk).astype(bf).reshape(Bt, S, D)        # fold 1/sqrt(d_k) into q
    k3 = k.astype(bf).reshape(Bt, S, D)
    v3 = v.reshape(Bt, S, D)                                   # f32; feeds attention + conv
    v3b = v3.astype(bf)

    # per-(row, head) scores / softmax only (everything matmul-heavy is full width)
    rows = []
    for b in range(Bt):
        bias_b = mask_bias[b]                                  # (1, S)
        heads = []
        for h in range(H):
            sl = slice(h * d_k, (h + 1) * d_k)
            s = lax.dot_general(q3[b, :, sl], k3[b, :, sl],
                                (((1,), (1,)), ((), ())),
                                preferred_element_type=jnp.float32)        # (S, S)
            s = s + bias_b                                     # masked_fill(mask == 0, -1e9)
            m = jnp.max(s, axis=-1, keepdims=True)
            e = jnp.exp(s - m)
            p = e * (1.0 / jnp.sum(e, axis=-1, keepdims=True))  # exact per-row reciprocal
            heads.append(jnp.dot(p.astype(bf), v3b[b, :, sl],
                                 preferred_element_type=jnp.float32))       # (S, d_k)
        rows.append(jnp.concatenate(heads, axis=-1))           # (S, D) = concat over heads
    attn = jnp.concatenate(rows, axis=0)                       # (BS, D)

    # local "same" Conv1d over the sequence as ONE matmul (contraction K*D):
    # aligned store into a zero guard-banded scratch, K shifted window reads, lane-concat.
    vpad_ref[:, pl.ds(_PAD_ROWS, S), :] = v3
    taps = []
    for kk in range(K):
        if kk == pad:
            taps.append(v3)                                    # center tap = v itself (aligned)
        else:
            taps.append(vpad_ref[:, pl.ds(_PAD_ROWS - pad + kk, S), :])
    win = jnp.concatenate(taps, axis=-1).astype(bf).reshape(BS, K * D)
    conv = jnp.dot(win, wconv_ref[...], preferred_element_type=jnp.float32) + bconv_ref[...]

    # single full-width output projection of (attn_concat + conv)
    mha = jnp.dot((attn + conv).astype(bf), wo_ref[...],
                  preferred_element_type=jnp.float32) + bo_ref[...]
    x = x + mha.reshape(Bt, S, D)                              # residual (dropout = identity)

    # ---------------- sublayer 1: LN -> position-wise FFN (SELU) ----------------
    xn2 = _layer_norm(x, ln2a_ref[...], ln2b_ref[...], eps)
    h1 = jnp.dot(xn2.astype(bf).reshape(BS, D), w1_ref[...],
                 preferred_element_type=jnp.float32) + b1_ref[...]
    # TODO(synk): switch to jnp.expm1 once Mosaic lowering for expm1 is confirmed.
    neg = jnp.exp(jnp.minimum(h1, 0.0)) - 1.0
    act = SELU_SCALE * jnp.where(h1 > 0.0, h1, SELU_ALPHA * neg)
    ffn = jnp.dot(act.astype(bf), w2_ref[...],
                  preferred_element_type=jnp.float32) + b2_ref[...]
    x = x + ffn.reshape(Bt, S, D)

    xres_ref[...] = x                                          # carry to the next layer step

    @pl.when(l == n_layers - 1)
    def _finalize():                                           # Encoder's final LayerNorm
        o_ref[...] = _layer_norm(x, fina_ref[...], finb_ref[...], eps)


# ------------------------- wrapper -------------------------

def positional_encoding(S, D, max_len=5000):
    position = jnp.arange(max_len, dtype=jnp.float32)[:, None]
    div_term = jnp.exp(jnp.arange(0, D, 2, dtype=jnp.float32)
                       * (-(math.log(10000.0) / D)))
    angles = position * div_term
    pe = jnp.zeros((max_len, D), jnp.float32)
    pe = pe.at[:, 0::2].set(jnp.sin(angles))
    pe = pe.at[:, 1::2].set(jnp.cos(angles))
    return pe[:S]


def _largest_batch_block(B, cap=8):
    return max(d for d in range(1, min(B, cap) + 1) if B % d == 0)


@partial(jax.jit, static_argnums=(3, 4))
def transformer_local_forward(x, mask, params, num_heads, kernel_size):
    """Equivalent of Transformer_local.forward('calc_text_and_visit', input, mask)."""
    B, S, D = x.shape
    H, K = num_heads, kernel_size
    assert D % H == 0 and K % 2 == 1 and (K - 1) // 2 <= _PAD_ROWS
    d_k = D // H
    L = params['wq'].shape[0]
    Bt = _largest_batch_block(B)            # batch rows per grid step (amortizes weight DMA)
    pe = positional_encoding(S, D)

    # bf16 weights for the MXU (f32 accumulation in-kernel); biases / LN params stay f32.
    bfc = jnp.bfloat16
    wq = params['wq'].astype(bfc)
    wk = params['wk'].astype(bfc)
    wv = params['wv'].astype(bfc)
    wo = params['wo'].astype(bfc)
    w1 = params['w1'].astype(bfc)
    w2 = params['w2'].astype(bfc)
    wconv = params['wconv'].reshape(L, K * D, D).astype(bfc)   # conv as one K*D-deep matmul

    def layer_spec(arr):   # one layer slice per (bt, l) step
        n_rest = arr.ndim - 1
        return pl.BlockSpec((None,) + arr.shape[1:],
                            lambda bt, l, n=n_rest: (l,) + (0,) * n)

    def const_spec(arr):   # constant across the grid
        n = arr.ndim
        return pl.BlockSpec(arr.shape, lambda bt, l, n=n: (0,) * n)

    operands = [
        (x,                 pl.BlockSpec((Bt, S, D), lambda bt, l: (bt, 0, 0))),
        (pe,                const_spec(pe)),
        (mask,              pl.BlockSpec((Bt, 1, S), lambda bt, l: (bt, 0, 0))),
        (params['ln1_a'],   layer_spec(params['ln1_a'])),
        (params['ln1_b'],   layer_spec(params['ln1_b'])),
        (wq,                layer_spec(wq)),
        (params['bq'],      layer_spec(params['bq'])),
        (wk,                layer_spec(wk)),
        (params['bk'],      layer_spec(params['bk'])),
        (wv,                layer_spec(wv)),
        (params['bv'],      layer_spec(params['bv'])),
        (wconv,             layer_spec(wconv)),
        (params['bconv'],   layer_spec(params['bconv'])),
        (wo,                layer_spec(wo)),
        (params['bo'],      layer_spec(params['bo'])),
        (params['ln2_a'],   layer_spec(params['ln2_a'])),
        (params['ln2_b'],   layer_spec(params['ln2_b'])),
        (w1,                layer_spec(w1)),
        (params['b1'],      layer_spec(params['b1'])),
        (w2,                layer_spec(w2)),
        (params['b2'],      layer_spec(params['b2'])),
        (params['final_a'], const_spec(params['final_a'])),
        (params['final_b'], const_spec(params['final_b'])),
    ]
    args = [a for a, _ in operands]
    in_specs = [s for _, s in operands]

    grid_spec = pltpu.PrefetchScalarGridSpec(
        num_scalar_prefetch=0,
        grid=(B // Bt, L),                      # layer axis last (resident scratch/output)
        in_specs=in_specs,
        out_specs=pl.BlockSpec((Bt, S, D), lambda bt, l: (bt, 0, 0)),
        scratch_shapes=[
            pltpu.VMEM((Bt, S, D), jnp.float32),                     # resident residual stream
            pltpu.VMEM((Bt, 2 * _PAD_ROWS + S, D), jnp.float32),     # conv guard-band buffer
        ],
    )

    return pl.pallas_call(
        partial(_fused_encoder_kernel, Bt=Bt, S=S, D=D, H=H, d_k=d_k, K=K, eps=1e-6),
        out_shape=jax.ShapeDtypeStruct((B, S, D), jnp.float32),
        grid_spec=grid_spec,
        compiler_params=pltpu.CompilerParams(
            dimension_semantics=("parallel", "arbitrary"),
            vmem_limit_bytes=48 * 1024 * 1024),
    )(*args)


# ------------------------- parameters & pure-JAX reference -------------------------

def init_params(key, D, H, K, n_layers):
    d_ff = 4 * D

    def lin(k, din, dout):
        kw, kb = jax.random.split(k)
        w = jax.random.normal(kw, (din, dout), jnp.float32) / math.sqrt(din)
        b = jax.random.normal(kb, (1, dout), jnp.float32) * 0.01
        return w, b

    keys = jax.random.split(key, n_layers)
    layers = []
    for i in range(n_layers):
        ks = jax.random.split(keys[i], 8)
        wq, bq = lin(ks[0], D, D)
        wk, bk = lin(ks[1], D, D)
        wv, bv = lin(ks[2], D, D)
        wo, bo = lin(ks[3], D, D)
        wconv = jax.random.normal(ks[4], (K, D, D), jnp.float32) / math.sqrt(D * K)
        bconv = jax.random.normal(ks[5], (1, D), jnp.float32) * 0.01
        w1, b1 = lin(ks[6], D, d_ff)
        w2, b2 = lin(ks[7], d_ff, D)
        layers.append(dict(
            ln1_a=jnp.ones((1, D), jnp.float32), ln1_b=jnp.zeros((1, D), jnp.float32),
            ln2_a=jnp.ones((1, D), jnp.float32), ln2_b=jnp.zeros((1, D), jnp.float32),
            wq=wq, bq=bq, wk=wk, bk=bk, wv=wv, bv=bv, wo=wo, bo=bo,
            wconv=wconv, bconv=bconv, w1=w1, b1=b1, w2=w2, b2=b2))
    stacked = {k: jnp.stack([lp[k] for lp in layers]) for k in layers[0]}
    stacked['final_a'] = jnp.ones((1, D), jnp.float32)
    stacked['final_b'] = jnp.zeros((1, D), jnp.float32)
    return stacked


def _reference_forward(x, mask, params, H, K):
    """Plain-JAX reference mirroring the PyTorch module (dropout in eval mode)."""
    B, S, D = x.shape
    d_k = D // H
    pad = (K - 1) // 2
    eps = 1e-6
    L = params['wq'].shape[0]

    def ln(v, a, b):
        mean = v.mean(-1, keepdims=True)
        std = jnp.sqrt(((v - mean) ** 2).sum(-1, keepdims=True) / (D - 1))
        return a * (v - mean) / (std + eps) + b

    h = x + positional_encoding(S, D)[None]
    for l in range(L):
        xn = ln(h, params['ln1_a'][l], params['ln1_b'][l])
        q = xn @ params['wq'][l] + params['bq'][l]
        k = xn @ params['wk'][l] + params['bk'][l]
        v = xn @ params['wv'][l] + params['bv'][l]
        qh = q.reshape(B, S, H, d_k).transpose(0, 2, 1, 3)
        kh = k.reshape(B, S, H, d_k).transpose(0, 2, 1, 3)
        vh = v.reshape(B, S, H, d_k).transpose(0, 2, 1, 3)
        scores = qh @ kh.transpose(0, 1, 3, 2) / math.sqrt(d_k)
        scores = jnp.where(mask[:, None, :, :] == 0.0, _NEG_INF, scores)
        p = jax.nn.softmax(scores, axis=-1)
        a = (p @ vh).transpose(0, 2, 1, 3).reshape(B, S, D)
        vpad = jnp.pad(v, ((0, 0), (pad, pad), (0, 0)))
        conv = sum(vpad[:, kk:kk + S, :] @ params['wconv'][l][kk] for kk in range(K)) \
            + params['bconv'][l]
        h = h + ((a + conv) @ params['wo'][l] + params['bo'][l])
        xn2 = ln(h, params['ln2_a'][l], params['ln2_b'][l])
        z = jax.nn.selu(xn2 @ params['w1'][l] + params['b1'][l])
        h = h + (z @ params['w2'][l] + params['b2'][l])
    return ln(h, params['final_a'], params['final_b'])


def _round_matmul_weights_to_bf16(params):
    # The kernel deliberately runs its matmul weights in bf16; compare against a reference
    # that uses the same bf16-rounded weights (f32 everywhere else).
    out = dict(params)
    for k in ('wq', 'wk', 'wv', 'wo', 'wconv', 'w1', 'w2'):
        out[k] = params[k].astype(jnp.bfloat16).astype(jnp.float32)
    return out


if __name__ == "__main__":
    # hidden_size=32, head_num=4, encoder_layers=2, local_kernel_size=3
    B, S, D, H, K, N_LAYERS = 2, 8, 32, 4, 3, 2
    key = jax.random.PRNGKey(0)
    kx, kp = jax.random.split(key)
    x = jax.random.normal(kx, (B, S, D), jnp.float32)                     # embeddings (B, S, D)
    mask = jnp.ones((B, 1, S), jnp.float32).at[1, 0, S - 2:].set(0.0)     # src mask (0 = pad)
    params = init_params(kp, D, H, K, N_LAYERS)

    out = transformer_local_forward(x, mask, params, H, K)
    out = jax.block_until_ready(out)
    assert out.shape == (B, S, D)
    assert bool(jnp.all(jnp.isfinite(out)))

    ref = _reference_forward(x, mask, _round_matmul_weights_to_bf16(params), H, K)
    max_err = float(jnp.max(jnp.abs(out - ref)))
    assert bool(jnp.allclose(out, ref, atol=5e-2, rtol=5e-2)), max_err
    # TODO(synk): dropout layers (attention, sublayer, FFN, positional) are modeled as
    # eval-mode identity (no RNG in forward).
    print("KERNEL_OK")
</pallas_src>

<mosaic_0001>
module attributes {stable_mosaic.version = 11 : i64} {
  func.func @_fused_encoder_kernel(%arg0: i32, %arg1: i32, %arg2: memref<2x8x32xf32, #tpu.memory_space<vmem>>, %arg3: memref<8x32xf32, #tpu.memory_space<vmem>>, %arg4: memref<2x1x8xf32, #tpu.memory_space<vmem>>, %arg5: memref<1x1x32xf32, #tpu.memory_space<vmem>>, %arg6: memref<1x1x32xf32, #tpu.memory_space<vmem>>, %arg7: memref<1x32x32xbf16, #tpu.memory_space<vmem>>, %arg8: memref<1x1x32xf32, #tpu.memory_space<vmem>>, %arg9: memref<1x32x32xbf16, #tpu.memory_space<vmem>>, %arg10: memref<1x1x32xf32, #tpu.memory_space<vmem>>, %arg11: memref<1x32x32xbf16, #tpu.memory_space<vmem>>, %arg12: memref<1x1x32xf32, #tpu.memory_space<vmem>>, %arg13: memref<1x96x32xbf16, #tpu.memory_space<vmem>>, %arg14: memref<1x1x32xf32, #tpu.memory_space<vmem>>, %arg15: memref<1x32x32xbf16, #tpu.memory_space<vmem>>, %arg16: memref<1x1x32xf32, #tpu.memory_space<vmem>>, %arg17: memref<1x1x32xf32, #tpu.memory_space<vmem>>, %arg18: memref<1x1x32xf32, #tpu.memory_space<vmem>>, %arg19: memref<1x32x128xbf16, #tpu.memory_space<vmem>>, %arg20: memref<1x1x128xf32, #tpu.memory_space<vmem>>, %arg21: memref<1x128x32xbf16, #tpu.memory_space<vmem>>, %arg22: memref<1x1x32xf32, #tpu.memory_space<vmem>>, %arg23: memref<1x32xf32, #tpu.memory_space<vmem>>, %arg24: memref<1x32xf32, #tpu.memory_space<vmem>>, %arg25: memref<2x8x32xf32, #tpu.memory_space<vmem>>, %arg26: memref<2x8x32xf32, #tpu.memory_space<vmem>>, %arg27: memref<2x24x32xf32, #tpu.memory_space<vmem>>) attributes {dimension_semantics = [#tpu.dimension_semantics<parallel>, #tpu.dimension_semantics<arbitrary>], iteration_bounds = array<i64: 1, 2>, scalar_prefetch = 0 : i64, scratch_operands = 2 : i64, tpu.core_type = #tpu.core_type<tc>, window_params = [{transform_indices = @transform_0, window_bounds = array<i64: 2, 8, 32>}, {pipeline_mode = #tpu.pipeline_mode<synchronous>, transform_indices = @transform_1, window_bounds = array<i64: 8, 32>}, {transform_indices = @transform_2, window_bounds = array<i64: 2, 1, 8>}, {transform_indices = @transform_3, window_bounds = array<i64: 1, 1, 32>}, {transform_indices = @transform_4, window_bounds = array<i64: 1, 1, 32>}, {transform_indices = @transform_5, window_bounds = array<i64: 1, 32, 32>}, {transform_indices = @transform_6, window_bounds = array<i64: 1, 1, 32>}, {transform_indices = @transform_7, window_bounds = array<i64: 1, 32, 32>}, {transform_indices = @transform_8, window_bounds = array<i64: 1, 1, 32>}, {transform_indices = @transform_9, window_bounds = array<i64: 1, 32, 32>}, {transform_indices = @transform_10, window_bounds = array<i64: 1, 1, 32>}, {transform_indices = @transform_11, window_bounds = array<i64: 1, 96, 32>}, {transform_indices = @transform_12, window_bounds = array<i64: 1, 1, 32>}, {transform_indices = @transform_13, window_bounds = array<i64: 1, 32, 32>}, {transform_indices = @transform_14, window_bounds = array<i64: 1, 1, 32>}, {transform_indices = @transform_15, window_bounds = array<i64: 1, 1, 32>}, {transform_indices = @transform_16, window_bounds = array<i64: 1, 1, 32>}, {transform_indices = @transform_17, window_bounds = array<i64: 1, 32, 128>}, {transform_indices = @transform_18, window_bounds = array<i64: 1, 1, 128>}, {transform_indices = @transform_19, window_bounds = array<i64: 1, 128, 32>}, {transform_indices = @transform_20, window_bounds = array<i64: 1, 1, 32>}, {pipeline_mode = #tpu.pipeline_mode<synchronous>, transform_indices = @transform_21, window_bounds = array<i64: 1, 32>}, {pipeline_mode = #tpu.pipeline_mode<synchronous>, transform_indices = @transform_22, window_bounds = array<i64: 1, 32>}, {transform_indices = @transform_23, window_bounds = array<i64: 2, 8, 32>}]} {
    %c0_i32 = arith.constant 0 : i32
    %0 = arith.cmpi eq, %arg1, %c0_i32 : i32
    %1 = arith.extui %0 : i1 to i32
    %c0_i32_0 = arith.constant 0 : i32
    %2 = arith.cmpi ne, %1, %c0_i32_0 : i32
    scf.if %2 {
      %c0_137 = arith.constant 0 : index
      %c0_138 = arith.constant 0 : index
      %c0_139 = arith.constant 0 : index
      %339 = vector.load %arg2[%c0_137, %c0_138, %c0_139] : memref<2x8x32xf32, #tpu.memory_space<vmem>>, vector<2x8x32xf32>
      %c0_140 = arith.constant 0 : index
      %c0_141 = arith.constant 0 : index
      %340 = vector.load %arg3[%c0_140, %c0_141] : memref<8x32xf32, #tpu.memory_space<vmem>>, vector<8x32xf32>
      %341 = vector.shape_cast %340 : vector<8x32xf32> to vector<1x8x32xf32>
      %342 = vector.broadcast %341 : vector<1x8x32xf32> to vector<2x8x32xf32>
      %343 = arith.addf %339, %342 : vector<2x8x32xf32>
      %c0_142 = arith.constant 0 : index
      %c0_143 = arith.constant 0 : index
      %c0_144 = arith.constant 0 : index
      %344 = vector.load %arg26[%c0_142, %c0_143, %c0_144] : memref<2x8x32xf32, #tpu.memory_space<vmem>>, vector<2x8x32xf32>
      tpu.vector_store %arg26[%c0_142, %c0_143, %c0_144], %343 {strides = array<i32>} : memref<2x8x32xf32, #tpu.memory_space<vmem>>, vector<2x8x32xf32>,
      %cst_145 = arith.constant 0.000000e+00 : f32
      %345 = vector.broadcast %cst_145 : f32 to vector<2x8x32xf32>
      %c0_146 = arith.constant 0 : index
      %c0_147 = arith.constant 0 : index
      %c0_148 = arith.constant 0 : index
      %346 = vector.load %arg27[%c0_146, %c0_147, %c0_148] : memref<2x24x32xf32, #tpu.memory_space<vmem>>, vector<2x8x32xf32>
      tpu.vector_store %arg27[%c0_146, %c0_147, %c0_148], %345 {strides = array<i32>} : memref<2x24x32xf32, #tpu.memory_space<vmem>>, vector<2x8x32xf32>,
      %c0_149 = arith.constant 0 : index
      %c16 = arith.constant 16 : index
      %c0_150 = arith.constant 0 : index
      %347 = vector.load %arg27[%c0_149, %c16, %c0_150] : memref<2x24x32xf32, #tpu.memory_space<vmem>>, vector<2x8x32xf32>
      tpu.vector_store %arg27[%c0_149, %c16, %c0_150], %345 {strides = array<i32>} : memref<2x24x32xf32, #tpu.memory_space<vmem>>, vector<2x8x32xf32>,
    } else {
    }
    %c0 = arith.constant 0 : index
    %c0_1 = arith.constant 0 : index
    %c0_2 = arith.constant 0 : index
    %3 = vector.load %arg26[%c0, %c0_1, %c0_2] : memref<2x8x32xf32, #tpu.memory_space<vmem>>, vector<2x8x32xf32>
    %c0_3 = arith.constant 0 : index
    %c0_4 = arith.constant 0 : index
    %c0_5 = arith.constant 0 : index
    %4 = vector.load %arg4[%c0_3, %c0_4, %c0_5] : memref<2x1x8xf32, #tpu.memory_space<vmem>>, vector<2x1x8xf32>
    %cst = arith.constant 0.000000e+00 : f32
    %5 = vector.broadcast %cst : f32 to vector<2x1x8xf32>
    %6 = arith.cmpf oeq, %4, %5 : vector<2x1x8xf32>
    %cst_6 = arith.constant -1.000000e+09 : f32
    %cst_7 = arith.constant 0.000000e+00 : f32
    %7 = vector.broadcast %cst_6 : f32 to vector<2x1x8xf32>
    %8 = vector.broadcast %cst_7 : f32 to vector<2x1x8xf32>
    %9 = arith.select %6, %7, %8 : vector<2x1x8xi1>, vector<2x1x8xf32>
    %c0_8 = arith.constant 0 : index
    %c0_9 = arith.constant 0 : index
    %c0_10 = arith.constant 0 : index
    %10 = vector.load %arg5[%c0_8, %c0_9, %c0_10] : memref<1x1x32xf32, #tpu.memory_space<vmem>>, vector<1x1x32xf32>
    %11 = vector.shape_cast %10 : vector<1x1x32xf32> to vector<1x32xf32>
    %c0_11 = arith.constant 0 : index
    %c0_12 = arith.constant 0 : index
    %c0_13 = arith.constant 0 : index
    %12 = vector.load %arg6[%c0_11, %c0_12, %c0_13] : memref<1x1x32xf32, #tpu.memory_space<vmem>>, vector<1x1x32xf32>
    %13 = vector.shape_cast %12 : vector<1x1x32xf32> to vector<1x32xf32>
    %cst_14 = arith.constant dense<0.000000e+00> : vector<2x8xf32>
    %14 = vector.multi_reduction <add>, %3, %cst_14 [2] : vector<2x8x32xf32> to vector<2x8xf32>
    %15 = vector.shape_cast %14 : vector<2x8xf32> to vector<2x8x1xf32>
    %cst_15 = arith.constant 3.200000e+01 : f32
    %16 = vector.broadcast %cst_15 : f32 to vector<2x8x1xf32>
    %17 = arith.divf %15, %16 : vector<2x8x1xf32>
    %18 = vector.broadcast %17 : vector<2x8x1xf32> to vector<2x8x32xf32>
    %19 = arith.subf %3, %18 : vector<2x8x32xf32>
    %20 = arith.mulf %19, %19 : vector<2x8x32xf32>
    %cst_16 = arith.constant dense<0.000000e+00> : vector<2x8xf32>
    %21 = vector.multi_reduction <add>, %20, %cst_16 [2] : vector<2x8x32xf32> to vector<2x8xf32>
    %22 = vector.shape_cast %21 : vector<2x8xf32> to vector<2x8x1xf32>
    %cst_17 = arith.constant 3.100000e+01 : f32
    %23 = vector.broadcast %cst_17 : f32 to vector<2x8x1xf32>
    %24 = arith.divf %22, %23 : vector<2x8x1xf32>
    %25 = math.sqrt %24 : vector<2x8x1xf32>
    %cst_18 = arith.constant 9.99999997E-7 : f32
    %26 = vector.broadcast %cst_18 : f32 to vector<2x8x1xf32>
    %27 = arith.addf %25, %26 : vector<2x8x1xf32>
    %cst_19 = arith.constant 1.000000e+00 : f32
    %28 = vector.broadcast %cst_19 : f32 to vector<2x8x1xf32>
    %29 = arith.divf %28, %27 : vector<2x8x1xf32>
    %30 = vector.broadcast %29 : vector<2x8x1xf32> to vector<2x8x32xf32>
    %31 = arith.mulf %19, %30 : vector<2x8x32xf32>
    %32 = vector.shape_cast %11 : vector<1x32xf32> to vector<1x1x32xf32>
    %33 = vector.broadcast %32 : vector<1x1x32xf32> to vector<2x8x32xf32>
    %34 = arith.mulf %33, %31 : vector<2x8x32xf32>
    %35 = vector.shape_cast %13 : vector<1x32xf32> to vector<1x1x32xf32>
    %36 = vector.broadcast %35 : vector<1x1x32xf32> to vector<2x8x32xf32>
    %37 = arith.addf %34, %36 : vector<2x8x32xf32>
    %38 = arith.truncf %37 : vector<2x8x32xf32> to vector<2x8x32xbf16>
    %39 = vector.shape_cast %38 : vector<2x8x32xbf16> to vector<16x32xbf16>
    %c0_20 = arith.constant 0 : index
    %c0_21 = arith.constant 0 : index
    %c0_22 = arith.constant 0 : index
    %40 = vector.load %arg7[%c0_20, %c0_21, %c0_22] : memref<1x32x32xbf16, #tpu.memory_space<vmem>>, vector<1x32x32xbf16>
    %41 = vector.shape_cast %40 : vector<1x32x32xbf16> to vector<32x32xbf16>
    %cst_23 = arith.constant dense<0.000000e+00> : vector<16x32xf32>
    %42 = tpu.matmul %39, %41, %cst_23 {dimension_numbers = #tpu.dot_dimension_numbers<[1], [0], [0], [1], [0, 0, 1, 1], [], []>} : vector<16x32xbf16>, vector<32x32xbf16>, vector<16x32xf32> -> vector<16x32xf32>
    %c0_24 = arith.constant 0 : index
    %c0_25 = arith.constant 0 : index
    %c0_26 = arith.constant 0 : index
    %43 = vector.load %arg8[%c0_24, %c0_25, %c0_26] : memref<1x1x32xf32, #tpu.memory_space<vmem>>, vector<1x1x32xf32>
    %44 = vector.shape_cast %43 : vector<1x1x32xf32> to vector<1x32xf32>
    %45 = vector.broadcast %44 : vector<1x32xf32> to vector<16x32xf32>
    %46 = arith.addf %42, %45 : vector<16x32xf32>
    %c0_27 = arith.constant 0 : index
    %c0_28 = arith.constant 0 : index
    %c0_29 = arith.constant 0 : index
    %47 = vector.load %arg9[%c0_27, %c0_28, %c0_29] : memref<1x32x32xbf16, #tpu.memory_space<vmem>>, vector<1x32x32xbf16>
    %48 = vector.shape_cast %47 : vector<1x32x32xbf16> to vector<32x32xbf16>
    %cst_30 = arith.constant dense<0.000000e+00> : vector<16x32xf32>
    %49 = tpu.matmul %39, %48, %cst_30 {dimension_numbers = #tpu.dot_dimension_numbers<[1], [0], [0], [1], [0, 0, 1, 1], [], []>} : vector<16x32xbf16>, vector<32x32xbf16>, vector<16x32xf32> -> vector<16x32xf32>
    %c0_31 = arith.constant 0 : index
    %c0_32 = arith.constant 0 : index
    %c0_33 = arith.constant 0 : index
    %50 = vector.load %arg10[%c0_31, %c0_32, %c0_33] : memref<1x1x32xf32, #tpu.memory_space<vmem>>, vector<1x1x32xf32>
    %51 = vector.shape_cast %50 : vector<1x1x32xf32> to vector<1x32xf32>
    %52 = vector.broadcast %51 : vector<1x32xf32> to vector<16x32xf32>
    %53 = arith.addf %49, %52 : vector<16x32xf32>
    %c0_34 = arith.constant 0 : index
    %c0_35 = arith.constant 0 : index
    %c0_36 = arith.constant 0 : index
    %54 = vector.load %arg11[%c0_34, %c0_35, %c0_36] : memref<1x32x32xbf16, #tpu.memory_space<vmem>>, vector<1x32x32xbf16>
    %55 = vector.shape_cast %54 : vector<1x32x32xbf16> to vector<32x32xbf16>
    %cst_37 = arith.constant dense<0.000000e+00> : vector<16x32xf32>
    %56 = tpu.matmul %39, %55, %cst_37 {dimension_numbers = #tpu.dot_dimension_numbers<[1], [0], [0], [1], [0, 0, 1, 1], [], []>} : vector<16x32xbf16>, vector<32x32xbf16>, vector<16x32xf32> -> vector<16x32xf32>
    %c0_38 = arith.constant 0 : index
    %c0_39 = arith.constant 0 : index
    %c0_40 = arith.constant 0 : index
    %57 = vector.load %arg12[%c0_38, %c0_39, %c0_40] : memref<1x1x32xf32, #tpu.memory_space<vmem>>, vector<1x1x32xf32>
    %58 = vector.shape_cast %57 : vector<1x1x32xf32> to vector<1x32xf32>
    %59 = vector.broadcast %58 : vector<1x32xf32> to vector<16x32xf32>
    %60 = arith.addf %56, %59 : vector<16x32xf32>
    %cst_41 = arith.constant 0.353553385 : f32
    %61 = vector.broadcast %cst_41 : f32 to vector<16x32xf32>
    %62 = arith.mulf %46, %61 : vector<16x32xf32>
    %63 = arith.truncf %62 : vector<16x32xf32> to vector<16x32xbf16>
    %64 = vector.shape_cast %63 : vector<16x32xbf16> to vector<2x8x32xbf16>
    %65 = arith.truncf %53 : vector<16x32xf32> to vector<16x32xbf16>
    %66 = vector.shape_cast %65 : vector<16x32xbf16> to vector<2x8x32xbf16>
    %67 = vector.shape_cast %60 : vector<16x32xf32> to vector<2x8x32xf32>
    %68 = arith.truncf %67 : vector<2x8x32xf32> to vector<2x8x32xbf16>
    %69 = vector.extract_strided_slice %9 {offsets = [0, 0, 0], sizes = [1, 1, 8], strides = [1, 1, 1]} : vector<2x1x8xf32> to vector<1x1x8xf32>
    %70 = vector.shape_cast %69 : vector<1x1x8xf32> to vector<1x8xf32>
    %71 = vector.extract_strided_slice %64 {offsets = [0, 0, 0], sizes = [1, 8, 8], strides = [1, 1, 1]} : vector<2x8x32xbf16> to vector<1x8x8xbf16>
    %72 = vector.shape_cast %71 : vector<1x8x8xbf16> to vector<8x8xbf16>
    %73 = vector.extract_strided_slice %66 {offsets = [0, 0, 0], sizes = [1, 8, 8], strides = [1, 1, 1]} : vector<2x8x32xbf16> to vector<1x8x8xbf16>
    %74 = vector.shape_cast %73 : vector<1x8x8xbf16> to vector<8x8xbf16>
    %cst_42 = arith.constant dense<0.000000e+00> : vector<8x8xf32>
    %75 = tpu.matmul %72, %74, %cst_42 {dimension_numbers = #tpu.dot_dimension_numbers<[1], [1], [0], [0], [0, 0, 1, 0], [], []>} : vector<8x8xbf16>, vector<8x8xbf16>, vector<8x8xf32> -> vector<8x8xf32>
    %76 = vector.broadcast %70 : vector<1x8xf32> to vector<8x8xf32>
    %77 = arith.addf %75, %76 : vector<8x8xf32>
    %cst_43 = arith.constant dense<0xFF800000> : vector<8xf32>
    %78 = vector.multi_reduction <maximumf>, %77, %cst_43 [1] : vector<8x8xf32> to vector<8xf32>
    %79 = vector.shape_cast %78 : vector<8xf32> to vector<8x1xf32>
    %80 = vector.broadcast %79 : vector<8x1xf32> to vector<8x8xf32>
    %81 = arith.subf %77, %80 : vector<8x8xf32>
    %82 = math.exp %81 : vector<8x8xf32>
    %cst_44 = arith.constant dense<0.000000e+00> : vector<8xf32>
    %83 = vector.multi_reduction <add>, %82, %cst_44 [1] : vector<8x8xf32> to vector<8xf32>
    %84 = vector.shape_cast %83 : vector<8xf32> to vector<8x1xf32>
    %cst_45 = arith.constant 1.000000e+00 : f32
    %85 = vector.broadcast %cst_45 : f32 to vector<8x1xf32>
    %86 = arith.divf %85, %84 : vector<8x1xf32>
    %87 = vector.broadcast %86 : vector<8x1xf32> to vector<8x8xf32>
    %88 = arith.mulf %82, %87 : vector<8x8xf32>
    %89 = arith.truncf %88 : vector<8x8xf32> to vector<8x8xbf16>
    %90 = vector.extract_strided_slice %68 {offsets = [0, 0, 0], sizes = [1, 8, 8], strides = [1, 1, 1]} : vector<2x8x32xbf16> to vector<1x8x8xbf16>
    %91 = vector.shape_cast %90 : vector<1x8x8xbf16> to vector<8x8xbf16>
    %cst_46 = arith.constant dense<0.000000e+00> : vector<8x8xf32>
    %92 = tpu.matmul %89, %91, %cst_46 {dimension_numbers = #tpu.dot_dimension_numbers<[1], [0], [0], [1], [0, 0, 1, 1], [], []>} : vector<8x8xbf16>, vector<8x8xbf16>, vector<8x8xf32> -> vector<8x8xf32>
    %93 = vector.extract_strided_slice %64 {offsets = [0, 0, 8], sizes = [1, 8, 8], strides = [1, 1, 1]} : vector<2x8x32xbf16> to vector<1x8x8xbf16>
    %94 = vector.shape_cast %93 : vector<1x8x8xbf16> to vector<8x8xbf16>
    %95 = vector.extract_strided_slice %66 {offsets = [0, 0, 8], sizes = [1, 8, 8], strides = [1, 1, 1]} : vector<2x8x32xbf16> to vector<1x8x8xbf16>
    %96 = vector.shape_cast %95 : vector<1x8x8xbf16> to vector<8x8xbf16>
    %cst_47 = arith.constant dense<0.000000e+00> : vector<8x8xf32>
    %97 = tpu.matmul %94, %96, %cst_47 {dimension_numbers = #tpu.dot_dimension_numbers<[1], [1], [0], [0], [0, 0, 1, 0], [], []>} : vector<8x8xbf16>, vector<8x8xbf16>, vector<8x8xf32> -> vector<8x8xf32>
    %98 = vector.broadcast %70 : vector<1x8xf32> to vector<8x8xf32>
    %99 = arith.addf %97, %98 : vector<8x8xf32>
    %cst_48 = arith.constant dense<0xFF800000> : vector<8xf32>
    %100 = vector.multi_reduction <maximumf>, %99, %cst_48 [1] : vector<8x8xf32> to vector<8xf32>
    %101 = vector.shape_cast %100 : vector<8xf32> to vector<8x1xf32>
    %102 = vector.broadcast %101 : vector<8x1xf32> to vector<8x8xf32>
    %103 = arith.subf %99, %102 : vector<8x8xf32>
    %104 = math.exp %103 : vector<8x8xf32>
    %cst_49 = arith.constant dense<0.000000e+00> : vector<8xf32>
    %105 = vector.multi_reduction <add>, %104, %cst_49 [1] : vector<8x8xf32> to vector<8xf32>
    %106 = vector.shape_cast %105 : vector<8xf32> to vector<8x1xf32>
    %cst_50 = arith.constant 1.000000e+00 : f32
    %107 = vector.broadcast %cst_50 : f32 to vector<8x1xf32>
    %108 = arith.divf %107, %106 : vector<8x1xf32>
    %109 = vector.broadcast %108 : vector<8x1xf32> to vector<8x8xf32>
    %110 = arith.mulf %104, %109 : vector<8x8xf32>
    %111 = arith.truncf %110 : vector<8x8xf32> to vector<8x8xbf16>
    %112 = vector.extract_strided_slice %68 {offsets = [0, 0, 8], sizes = [1, 8, 8], strides = [1, 1, 1]} : vector<2x8x32xbf16> to vector<1x8x8xbf16>
    %113 = vector.shape_cast %112 : vector<1x8x8xbf16> to vector<8x8xbf16>
    %cst_51 = arith.constant dense<0.000000e+00> : vector<8x8xf32>
    %114 = tpu.matmul %111, %113, %cst_51 {dimension_numbers = #tpu.dot_dimension_numbers<[1], [0], [0], [1], [0, 0, 1, 1], [], []>} : vector<8x8xbf16>, vector<8x8xbf16>, vector<8x8xf32> -> vector<8x8xf32>
    %115 = vector.extract_strided_slice %64 {offsets = [0, 0, 16], sizes = [1, 8, 8], strides = [1, 1, 1]} : vector<2x8x32xbf16> to vector<1x8x8xbf16>
    %116 = vector.shape_cast %115 : vector<1x8x8xbf16> to vector<8x8xbf16>
    %117 = vector.extract_strided_slice %66 {offsets = [0, 0, 16], sizes = [1, 8, 8], strides = [1, 1, 1]} : vector<2x8x32xbf16> to vector<1x8x8xbf16>
    %118 = vector.shape_cast %117 : vector<1x8x8xbf16> to vector<8x8xbf16>
    %cst_52 = arith.constant dense<0.000000e+00> : vector<8x8xf32>
    %119 = tpu.matmul %116, %118, %cst_52 {dimension_numbers = #tpu.dot_dimension_numbers<[1], [1], [0], [0], [0, 0, 1, 0], [], []>} : vector<8x8xbf16>, vector<8x8xbf16>, vector<8x8xf32> -> vector<8x8xf32>
    %120 = vector.broadcast %70 : vector<1x8xf32> to vector<8x8xf32>
    %121 = arith.addf %119, %120 : vector<8x8xf32>
    %cst_53 = arith.constant dense<0xFF800000> : vector<8xf32>
    %122 = vector.multi_reduction <maximumf>, %121, %cst_53 [1] : vector<8x8xf32> to vector<8xf32>
    %123 = vector.shape_cast %122 : vector<8xf32> to vector<8x1xf32>
    %124 = vector.broadcast %123 : vector<8x1xf32> to vector<8x8xf32>
    %125 = arith.subf %121, %124 : vector<8x8xf32>
    %126 = math.exp %125 : vector<8x8xf32>
    %cst_54 = arith.constant dense<0.000000e+00> : vector<8xf32>
    %127 = vector.multi_reduction <add>, %126, %cst_54 [1] : vector<8x8xf32> to vector<8xf32>
    %128 = vector.shape_cast %127 : vector<8xf32> to vector<8x1xf32>
    %cst_55 = arith.constant 1.000000e+00 : f32
    %129 = vector.broadcast %cst_55 : f32 to vector<8x1xf32>
    %130 = arith.divf %129, %128 : vector<8x1xf32>
    %131 = vector.broadcast %130 : vector<8x1xf32> to vector<8x8xf32>
    %132 = arith.mulf %126, %131 : vector<8x8xf32>
    %133 = arith.truncf %132 : vector<8x8xf32> to vector<8x8xbf16>
    %134 = vector.extract_strided_slice %68 {offsets = [0, 0, 16], sizes = [1, 8, 8], strides = [1, 1, 1]} : vector<2x8x32xbf16> to vector<1x8x8xbf16>
    %135 = vector.shape_cast %134 : vector<1x8x8xbf16> to vector<8x8xbf16>
    %cst_56 = arith.constant dense<0.000000e+00> : vector<8x8xf32>
    %136 = tpu.matmul %133, %135, %cst_56 {dimension_numbers = #tpu.dot_dimension_numbers<[1], [0], [0], [1], [0, 0, 1, 1], [], []>} : vector<8x8xbf16>, vector<8x8xbf16>, vector<8x8xf32> -> vector<8x8xf32>
    %137 = vector.extract_strided_slice %64 {offsets = [0, 0, 24], sizes = [1, 8, 8], strides = [1, 1, 1]} : vector<2x8x32xbf16> to vector<1x8x8xbf16>
    %138 = vector.shape_cast %137 : vector<1x8x8xbf16> to vector<8x8xbf16>
    %139 = vector.extract_strided_slice %66 {offsets = [0, 0, 24], sizes = [1, 8, 8], strides = [1, 1, 1]} : vector<2x8x32xbf16> to vector<1x8x8xbf16>
    %140 = vector.shape_cast %139 : vector<1x8x8xbf16> to vector<8x8xbf16>
    %cst_57 = arith.constant dense<0.000000e+00> : vector<8x8xf32>
    %141 = tpu.matmul %138, %140, %cst_57 {dimension_numbers = #tpu.dot_dimension_numbers<[1], [1], [0], [0], [0, 0, 1, 0], [], []>} : vector<8x8xbf16>, vector<8x8xbf16>, vector<8x8xf32> -> vector<8x8xf32>
    %142 = vector.broadcast %70 : vector<1x8xf32> to vector<8x8xf32>
    %143 = arith.addf %141, %142 : vector<8x8xf32>
    %cst_58 = arith.constant dense<0xFF800000> : vector<8xf32>
    %144 = vector.multi_reduction <maximumf>, %143, %cst_58 [1] : vector<8x8xf32> to vector<8xf32>
    %145 = vector.shape_cast %144 : vector<8xf32> to vector<8x1xf32>
    %146 = vector.broadcast %145 : vector<8x1xf32> to vector<8x8xf32>
    %147 = arith.subf %143, %146 : vector<8x8xf32>
    %148 = math.exp %147 : vector<8x8xf32>
    %cst_59 = arith.constant dense<0.000000e+00> : vector<8xf32>
    %149 = vector.multi_reduction <add>, %148, %cst_59 [1] : vector<8x8xf32> to vector<8xf32>
    %150 = vector.shape_cast %149 : vector<8xf32> to vector<8x1xf32>
    %cst_60 = arith.constant 1.000000e+00 : f32
    %151 = vector.broadcast %cst_60 : f32 to vector<8x1xf32>
    %152 = arith.divf %151, %150 : vector<8x1xf32>
    %153 = vector.broadcast %152 : vector<8x1xf32> to vector<8x8xf32>
    %154 = arith.mulf %148, %153 : vector<8x8xf32>
    %155 = arith.truncf %154 : vector<8x8xf32> to vector<8x8xbf16>
    %156 = vector.extract_strided_slice %68 {offsets = [0, 0, 24], sizes = [1, 8, 8], strides = [1, 1, 1]} : vector<2x8x32xbf16> to vector<1x8x8xbf16>
    %157 = vector.shape_cast %156 : vector<1x8x8xbf16> to vector<8x8xbf16>
    %cst_61 = arith.constant dense<0.000000e+00> : vector<8x8xf32>
    %158 = tpu.matmul %155, %157, %cst_61 {dimension_numbers = #tpu.dot_dimension_numbers<[1], [0], [0], [1], [0, 0, 1, 1], [], []>} : vector<8x8xbf16>, vector<8x8xbf16>, vector<8x8xf32> -> vector<8x8xf32>
    %159 = tpu.concatenate %92, %114, %136, %158 in 1 : vector<8x8xf32>, vector<8x8xf32>, vector<8x8xf32>, vector<8x8xf32> -> vector<8x32xf32>
    %160 = vector.extract_strided_slice %9 {offsets = [1, 0, 0], sizes = [1, 1, 8], strides = [1, 1, 1]} : vector<2x1x8xf32> to vector<1x1x8xf32>
    %161 = vector.shape_cast %160 : vector<1x1x8xf32> to vector<1x8xf32>
    %162 = vector.extract_strided_slice %64 {offsets = [1, 0, 0], sizes = [1, 8, 8], strides = [1, 1, 1]} : vector<2x8x32xbf16> to vector<1x8x8xbf16>
    %163 = vector.shape_cast %162 : vector<1x8x8xbf16> to vector<8x8xbf16>
    %164 = vector.extract_strided_slice %66 {offsets = [1, 0, 0], sizes = [1, 8, 8], strides = [1, 1, 1]} : vector<2x8x32xbf16> to vector<1x8x8xbf16>
    %165 = vector.shape_cast %164 : vector<1x8x8xbf16> to vector<8x8xbf16>
    %cst_62 = arith.constant dense<0.000000e+00> : vector<8x8xf32>
    %166 = tpu.matmul %163, %165, %cst_62 {dimension_numbers = #tpu.dot_dimension_numbers<[1], [1], [0], [0], [0, 0, 1, 0], [], []>} : vector<8x8xbf16>, vector<8x8xbf16>, vector<8x8xf32> -> vector<8x8xf32>
    %167 = vector.broadcast %161 : vector<1x8xf32> to vector<8x8xf32>
    %168 = arith.addf %166, %167 : vector<8x8xf32>
    %cst_63 = arith.constant dense<0xFF800000> : vector<8xf32>
    %169 = vector.multi_reduction <maximumf>, %168, %cst_63 [1] : vector<8x8xf32> to vector<8xf32>
    %170 = vector.shape_cast %169 : vector<8xf32> to vector<8x1xf32>
    %171 = vector.broadcast %170 : vector<8x1xf32> to vector<8x8xf32>
    %172 = arith.subf %168, %171 : vector<8x8xf32>
    %173 = math.exp %172 : vector<8x8xf32>
    %cst_64 = arith.constant dense<0.000000e+00> : vector<8xf32>
    %174 = vector.multi_reduction <add>, %173, %cst_64 [1] : vector<8x8xf32> to vector<8xf32>
    %175 = vector.shape_cast %174 : vector<8xf32> to vector<8x1xf32>
    %cst_65 = arith.constant 1.000000e+00 : f32
    %176 = vector.broadcast %cst_65 : f32 to vector<8x1xf32>
    %177 = arith.divf %176, %175 : vector<8x1xf32>
    %178 = vector.broadcast %177 : vector<8x1xf32> to vector<8x8xf32>
    %179 = arith.mulf %173, %178 : vector<8x8xf32>
    %180 = arith.truncf %179 : vector<8x8xf32> to vector<8x8xbf16>
    %181 = vector.extract_strided_slice %68 {offsets = [1, 0, 0], sizes = [1, 8, 8], strides = [1, 1, 1]} : vector<2x8x32xbf16> to vector<1x8x8xbf16>
    %182 = vector.shape_cast %181 : vector<1x8x8xbf16> to vector<8x8xbf16>
    %cst_66 = arith.constant dense<0.000000e+00> : vector<8x8xf32>
    %183 = tpu.matmul %180, %182, %cst_66 {dimension_numbers = #tpu.dot_dimension_numbers<[1], [0], [0], [1], [0, 0, 1, 1], [], []>} : vector<8x8xbf16>, vector<8x8xbf16>, vector<8x8xf32> -> vector<8x8xf32>
    %184 = vector.extract_strided_slice %64 {offsets = [1, 0, 8], sizes = [1, 8, 8], strides = [1, 1, 1]} : vector<2x8x32xbf16> to vector<1x8x8xbf16>
    %185 = vector.shape_cast %184 : vector<1x8x8xbf16> to vector<8x8xbf16>
    %186 = vector.extract_strided_slice %66 {offsets = [1, 0, 8], sizes = [1, 8, 8], strides = [1, 1, 1]} : vector<2x8x32xbf16> to vector<1x8x8xbf16>
    %187 = vector.shape_cast %186 : vector<1x8x8xbf16> to vector<8x8xbf16>
    %cst_67 = arith.constant dense<0.000000e+00> : vector<8x8xf32>
    %188 = tpu.matmul %185, %187, %cst_67 {dimension_numbers = #tpu.dot_dimension_numbers<[1], [1], [0], [0], [0, 0, 1, 0], [], []>} : vector<8x8xbf16>, vector<8x8xbf16>, vector<8x8xf32> -> vector<8x8xf32>
    %189 = vector.broadcast %161 : vector<1x8xf32> to vector<8x8xf32>
    %190 = arith.addf %188, %189 : vector<8x8xf32>
    %cst_68 = arith.constant dense<0xFF800000> : vector<8xf32>
    %191 = vector.multi_reduction <maximumf>, %190, %cst_68 [1] : vector<8x8xf32> to vector<8xf32>
    %192 = vector.shape_cast %191 : vector<8xf32> to vector<8x1xf32>
    %193 = vector.broadcast %192 : vector<8x1xf32> to vector<8x8xf32>
    %194 = arith.subf %190, %193 : vector<8x8xf32>
    %195 = math.exp %194 : vector<8x8xf32>
    %cst_69 = arith.constant dense<0.000000e+00> : vector<8xf32>
    %196 = vector.multi_reduction <add>, %195, %cst_69 [1] : vector<8x8xf32> to vector<8xf32>
    %197 = vector.shape_cast %196 : vector<8xf32> to vector<8x1xf32>
    %cst_70 = arith.constant 1.000000e+00 : f32
    %198 = vector.broadcast %cst_70 : f32 to vector<8x1xf32>
    %199 = arith.divf %198, %197 : vector<8x1xf32>
    %200 = vector.broadcast %199 : vector<8x1xf32> to vector<8x8xf32>
    %201 = arith.mulf %195, %200 : vector<8x8xf32>
    %202 = arith.truncf %201 : vector<8x8xf32> to vector<8x8xbf16>
    %203 = vector.extract_strided_slice %68 {offsets = [1, 0, 8], sizes = [1, 8, 8], strides = [1, 1, 1]} : vector<2x8x32xbf16> to vector<1x8x8xbf16>
    %204 = vector.shape_cast %203 : vector<1x8x8xbf16> to vector<8x8xbf16>
    %cst_71 = arith.constant dense<0.000000e+00> : vector<8x8xf32>
    %205 = tpu.matmul %202, %204, %cst_71 {dimension_numbers = #tpu.dot_dimension_numbers<[1], [0], [0], [1], [0, 0, 1, 1], [], []>} : vector<8x8xbf16>, vector<8x8xbf16>, vector<8x8xf32> -> vector<8x8xf32>
    %206 = vector.extract_strided_slice %64 {offsets = [1, 0, 16], sizes = [1, 8, 8], strides = [1, 1, 1]} : vector<2x8x32xbf16> to vector<1x8x8xbf16>
    %207 = vector.shape_cast %206 : vector<1x8x8xbf16> to vector<8x8xbf16>
    %208 = vector.extract_strided_slice %66 {offsets = [1, 0, 16], sizes = [1, 8, 8], strides = [1, 1, 1]} : vector<2x8x32xbf16> to vector<1x8x8xbf16>
    %209 = vector.shape_cast %208 : vector<1x8x8xbf16> to vector<8x8xbf16>
    %cst_72 = arith.constant dense<0.000000e+00> : vector<8x8xf32>
    %210 = tpu.matmul %207, %209, %cst_72 {dimension_numbers = #tpu.dot_dimension_numbers<[1], [1], [0], [0], [0, 0, 1, 0], [], []>} : vector<8x8xbf16>, vector<8x8xbf16>, vector<8x8xf32> -> vector<8x8xf32>
    %211 = vector.broadcast %161 : vector<1x8xf32> to vector<8x8xf32>
    %212 = arith.addf %210, %211 : vector<8x8xf32>
    %cst_73 = arith.constant dense<0xFF800000> : vector<8xf32>
    %213 = vector.multi_reduction <maximumf>, %212, %cst_73 [1] : vector<8x8xf32> to vector<8xf32>
    %214 = vector.shape_cast %213 : vector<8xf32> to vector<8x1xf32>
    %215 = vector.broadcast %214 : vector<8x1xf32> to vector<8x8xf32>
    %216 = arith.subf %212, %215 : vector<8x8xf32>
    %217 = math.exp %216 : vector<8x8xf32>
    %cst_74 = arith.constant dense<0.000000e+00> : vector<8xf32>
    %218 = vector.multi_reduction <add>, %217, %cst_74 [1] : vector<8x8xf32> to vector<8xf32>
    %219 = vector.shape_cast %218 : vector<8xf32> to vector<8x1xf32>
    %cst_75 = arith.constant 1.000000e+00 : f32
    %220 = vector.broadcast %cst_75 : f32 to vector<8x1xf32>
    %221 = arith.divf %220, %219 : vector<8x1xf32>
    %222 = vector.broadcast %221 : vector<8x1xf32> to vector<8x8xf32>
    %223 = arith.mulf %217, %222 : vector<8x8xf32>
    %224 = arith.truncf %223 : vector<8x8xf32> to vector<8x8xbf16>
    %225 = vector.extract_strided_slice %68 {offsets = [1, 0, 16], sizes = [1, 8, 8], strides = [1, 1, 1]} : vector<2x8x32xbf16> to vector<1x8x8xbf16>
    %226 = vector.shape_cast %225 : vector<1x8x8xbf16> to vector<8x8xbf16>
    %cst_76 = arith.constant dense<0.000000e+00> : vector<8x8xf32>
    %227 = tpu.matmul %224, %226, %cst_76 {dimension_numbers = #tpu.dot_dimension_numbers<[1], [0], [0], [1], [0, 0, 1, 1], [], []>} : vector<8x8xbf16>, vector<8x8xbf16>, vector<8x8xf32> -> vector<8x8xf32>
    %228 = vector.extract_strided_slice %64 {offsets = [1, 0, 24], sizes = [1, 8, 8], strides = [1, 1, 1]} : vector<2x8x32xbf16> to vector<1x8x8xbf16>
    %229 = vector.shape_cast %228 : vector<1x8x8xbf16> to vector<8x8xbf16>
    %230 = vector.extract_strided_slice %66 {offsets = [1, 0, 24], sizes = [1, 8, 8], strides = [1, 1, 1]} : vector<2x8x32xbf16> to vector<1x8x8xbf16>
    %231 = vector.shape_cast %230 : vector<1x8x8xbf16> to vector<8x8xbf16>
    %cst_77 = arith.constant dense<0.000000e+00> : vector<8x8xf32>
    %232 = tpu.matmul %229, %231, %cst_77 {dimension_numbers = #tpu.dot_dimension_numbers<[1], [1], [0], [0], [0, 0, 1, 0], [], []>} : vector<8x8xbf16>, vector<8x8xbf16>, vector<8x8xf32> -> vector<8x8xf32>
    %233 = vector.broadcast %161 : vector<1x8xf32> to vector<8x8xf32>
    %234 = arith.addf %232, %233 : vector<8x8xf32>
    %cst_78 = arith.constant dense<0xFF800000> : vector<8xf32>
    %235 = vector.multi_reduction <maximumf>, %234, %cst_78 [1] : vector<8x8xf32> to vector<8xf32>
    %236 = vector.shape_cast %235 : vector<8xf32> to vector<8x1xf32>
    %237 = vector.broadcast %236 : vector<8x1xf32> to vector<8x8xf32>
    %238 = arith.subf %234, %237 : vector<8x8xf32>
    %239 = math.exp %238 : vector<8x8xf32>
    %cst_79 = arith.constant dense<0.000000e+00> : vector<8xf32>
    %240 = vector.multi_reduction <add>, %239, %cst_79 [1] : vector<8x8xf32> to vector<8xf32>
    %241 = vector.shape_cast %240 : vector<8xf32> to vector<8x1xf32>
    %cst_80 = arith.constant 1.000000e+00 : f32
    %242 = vector.broadcast %cst_80 : f32 to vector<8x1xf32>
    %243 = arith.divf %242, %241 : vector<8x1xf32>
    %244 = vector.broadcast %243 : vector<8x1xf32> to vector<8x8xf32>
    %245 = arith.mulf %239, %244 : vector<8x8xf32>
    %246 = arith.truncf %245 : vector<8x8xf32> to vector<8x8xbf16>
    %247 = vector.extract_strided_slice %68 {offsets = [1, 0, 24], sizes = [1, 8, 8], strides = [1, 1, 1]} : vector<2x8x32xbf16> to vector<1x8x8xbf16>
    %248 = vector.shape_cast %247 : vector<1x8x8xbf16> to vector<8x8xbf16>
    %cst_81 = arith.constant dense<0.000000e+00> : vector<8x8xf32>
    %249 = tpu.matmul %246, %248, %cst_81 {dimension_numbers = #tpu.dot_dimension_numbers<[1], [0], [0], [1], [0, 0, 1, 1], [], []>} : vector<8x8xbf16>, vector<8x8xbf16>, vector<8x8xf32> -> vector<8x8xf32>
    %250 = tpu.concatenate %183, %205, %227, %249 in 1 : vector<8x8xf32>, vector<8x8xf32>, vector<8x8xf32>, vector<8x8xf32> -> vector<8x32xf32>
    %251 = tpu.concatenate %159, %250 in 0 : vector<8x32xf32>, vector<8x32xf32> -> vector<16x32xf32>
    %c0_82 = arith.constant 0 : index
    %c8 = arith.constant 8 : index
    %c0_83 = arith.constant 0 : index
    %252 = vector.load %arg27[%c0_82, %c8, %c0_83] : memref<2x24x32xf32, #tpu.memory_space<vmem>>, vector<2x8x32xf32>
    tpu.vector_store %arg27[%c0_82, %c8, %c0_83], %67 {strides = array<i32>} : memref<2x24x32xf32, #tpu.memory_space<vmem>>, vector<2x8x32xf32>,
    %c0_84 = arith.constant 0 : index
    %c7 = arith.constant 7 : index
    %c0_85 = arith.constant 0 : index
    %253 = vector.load %arg27[%c0_84, %c7, %c0_85] : memref<2x24x32xf32, #tpu.memory_space<vmem>>, vector<2x8x32xf32>
    %c0_86 = arith.constant 0 : index
    %c9 = arith.constant 9 : index
    %c0_87 = arith.constant 0 : index
    %254 = vector.load %arg27[%c0_86, %c9, %c0_87] : memref<2x24x32xf32, #tpu.memory_space<vmem>>, vector<2x8x32xf32>
    %255 = tpu.concatenate %253, %67, %254 in 2 : vector<2x8x32xf32>, vector<2x8x32xf32>, vector<2x8x32xf32> -> vector<2x8x96xf32>
    %256 = arith.truncf %255 : vector<2x8x96xf32> to vector<2x8x96xbf16>
    %257 = vector.shape_cast %256 : vector<2x8x96xbf16> to vector<16x96xbf16>
    %c0_88 = arith.constant 0 : index
    %c0_89 = arith.constant 0 : index
    %c0_90 = arith.constant 0 : index
    %258 = vector.load %arg13[%c0_88, %c0_89, %c0_90] : memref<1x96x32xbf16, #tpu.memory_space<vmem>>, vector<1x96x32xbf16>
    %259 = vector.shape_cast %258 : vector<1x96x32xbf16> to vector<96x32xbf16>
    %cst_91 = arith.constant dense<0.000000e+00> : vector<16x32xf32>
    %260 = tpu.matmul %257, %259, %cst_91 {dimension_numbers = #tpu.dot_dimension_numbers<[1], [0], [0], [1], [0, 0, 1, 1], [], []>} : vector<16x96xbf16>, vector<96x32xbf16>, vector<16x32xf32> -> vector<16x32xf32>
    %c0_92 = arith.constant 0 : index
    %c0_93 = arith.constant 0 : index
    %c0_94 = arith.constant 0 : index
    %261 = vector.load %arg14[%c0_92, %c0_93, %c0_94] : memref<1x1x32xf32, #tpu.memory_space<vmem>>, vector<1x1x32xf32>
    %262 = vector.shape_cast %261 : vector<1x1x32xf32> to vector<1x32xf32>
    %263 = vector.broadcast %262 : vector<1x32xf32> to vector<16x32xf32>
    %264 = arith.addf %260, %263 : vector<16x32xf32>
    %265 = arith.addf %251, %264 : vector<16x32xf32>
    %266 = arith.truncf %265 : vector<16x32xf32> to vector<16x32xbf16>
    %c0_95 = arith.constant 0 : index
    %c0_96 = arith.constant 0 : index
    %c0_97 = arith.constant 0 : index
    %267 = vector.load %arg15[%c0_95, %c0_96, %c0_97] : memref<1x32x32xbf16, #tpu.memory_space<vmem>>, vector<1x32x32xbf16>
    %268 = vector.shape_cast %267 : vector<1x32x32xbf16> to vector<32x32xbf16>
    %cst_98 = arith.constant dense<0.000000e+00> : vector<16x32xf32>
    %269 = tpu.matmul %266, %268, %cst_98 {dimension_numbers = #tpu.dot_dimension_numbers<[1], [0], [0], [1], [0, 0, 1, 1], [], []>} : vector<16x32xbf16>, vector<32x32xbf16>, vector<16x32xf32> -> vector<16x32xf32>
    %c0_99 = arith.constant 0 : index
    %c0_100 = arith.constant 0 : index
    %c0_101 = arith.constant 0 : index
    %270 = vector.load %arg16[%c0_99, %c0_100, %c0_101] : memref<1x1x32xf32, #tpu.memory_space<vmem>>, vector<1x1x32xf32>
    %271 = vector.shape_cast %270 : vector<1x1x32xf32> to vector<1x32xf32>
    %272 = vector.broadcast %271 : vector<1x32xf32> to vector<16x32xf32>
    %273 = arith.addf %269, %272 : vector<16x32xf32>
    %274 = vector.shape_cast %273 : vector<16x32xf32> to vector<2x8x32xf32>
    %275 = arith.addf %3, %274 : vector<2x8x32xf32>
    %c0_102 = arith.constant 0 : index
    %c0_103 = arith.constant 0 : index
    %c0_104 = arith.constant 0 : index
    %276 = vector.load %arg17[%c0_102, %c0_103, %c0_104] : memref<1x1x32xf32, #tpu.memory_space<vmem>>, vector<1x1x32xf32>
    %277 = vector.shape_cast %276 : vector<1x1x32xf32> to vector<1x32xf32>
    %c0_105 = arith.constant 0 : index
    %c0_106 = arith.constant 0 : index
    %c0_107 = arith.constant 0 : index
    %278 = vector.load %arg18[%c0_105, %c0_106, %c0_107] : memref<1x1x32xf32, #tpu.memory_space<vmem>>, vector<1x1x32xf32>
    %279 = vector.shape_cast %278 : vector<1x1x32xf32> to vector<1x32xf32>
    %cst_108 = arith.constant dense<0.000000e+00> : vector<2x8xf32>
    %280 = vector.multi_reduction <add>, %275, %cst_108 [2] : vector<2x8x32xf32> to vector<2x8xf32>
    %281 = vector.shape_cast %280 : vector<2x8xf32> to vector<2x8x1xf32>
    %cst_109 = arith.constant 3.200000e+01 : f32
    %282 = vector.broadcast %cst_109 : f32 to vector<2x8x1xf32>
    %283 = arith.divf %281, %282 : vector<2x8x1xf32>
    %284 = vector.broadcast %283 : vector<2x8x1xf32> to vector<2x8x32xf32>
    %285 = arith.subf %275, %284 : vector<2x8x32xf32>
    %286 = arith.mulf %285, %285 : vector<2x8x32xf32>
    %cst_110 = arith.constant dense<0.000000e+00> : vector<2x8xf32>
    %287 = vector.multi_reduction <add>, %286, %cst_110 [2] : vector<2x8x32xf32> to vector<2x8xf32>
    %288 = vector.shape_cast %287 : vector<2x8xf32> to vector<2x8x1xf32>
    %cst_111 = arith.constant 3.100000e+01 : f32
    %289 = vector.broadcast %cst_111 : f32 to vector<2x8x1xf32>
    %290 = arith.divf %288, %289 : vector<2x8x1xf32>
    %291 = math.sqrt %290 : vector<2x8x1xf32>
    %cst_112 = arith.constant 9.99999997E-7 : f32
    %292 = vector.broadcast %cst_112 : f32 to vector<2x8x1xf32>
    %293 = arith.addf %291, %292 : vector<2x8x1xf32>
    %cst_113 = arith.constant 1.000000e+00 : f32
    %294 = vector.broadcast %cst_113 : f32 to vector<2x8x1xf32>
    %295 = arith.divf %294, %293 : vector<2x8x1xf32>
    %296 = vector.broadcast %295 : vector<2x8x1xf32> to vector<2x8x32xf32>
    %297 = arith.mulf %285, %296 : vector<2x8x32xf32>
    %298 = vector.shape_cast %277 : vector<1x32xf32> to vector<1x1x32xf32>
    %299 = vector.broadcast %298 : vector<1x1x32xf32> to vector<2x8x32xf32>
    %300 = arith.mulf %299, %297 : vector<2x8x32xf32>
    %301 = vector.shape_cast %279 : vector<1x32xf32> to vector<1x1x32xf32>
    %302 = vector.broadcast %301 : vector<1x1x32xf32> to vector<2x8x32xf32>
    %303 = arith.addf %300, %302 : vector<2x8x32xf32>
    %304 = arith.truncf %303 : vector<2x8x32xf32> to vector<2x8x32xbf16>
    %305 = vector.shape_cast %304 : vector<2x8x32xbf16> to vector<16x32xbf16>
    %c0_114 = arith.constant 0 : index
    %c0_115 = arith.constant 0 : index
    %c0_116 = arith.constant 0 : index
    %306 = vector.load %arg19[%c0_114, %c0_115, %c0_116] : memref<1x32x128xbf16, #tpu.memory_space<vmem>>, vector<1x32x128xbf16>
    %307 = vector.shape_cast %306 : vector<1x32x128xbf16> to vector<32x128xbf16>
    %cst_117 = arith.constant dense<0.000000e+00> : vector<16x128xf32>
    %308 = tpu.matmul %305, %307, %cst_117 {dimension_numbers = #tpu.dot_dimension_numbers<[1], [0], [0], [1], [0, 0, 1, 1], [], []>} : vector<16x32xbf16>, vector<32x128xbf16>, vector<16x128xf32> -> vector<16x128xf32>
    %c0_118 = arith.constant 0 : index
    %c0_119 = arith.constant 0 : index
    %c0_120 = arith.constant 0 : index
    %309 = vector.load %arg20[%c0_118, %c0_119, %c0_120] : memref<1x1x128xf32, #tpu.memory_space<vmem>>, vector<1x1x128xf32>
    %310 = vector.shape_cast %309 : vector<1x1x128xf32> to vector<1x128xf32>
    %311 = vector.broadcast %310 : vector<1x128xf32> to vector<16x128xf32>
    %312 = arith.addf %308, %311 : vector<16x128xf32>
    %cst_121 = arith.constant 0.000000e+00 : f32
    %313 = vector.broadcast %cst_121 : f32 to vector<16x128xf32>
    %314 = arith.minimumf %312, %313 : vector<16x128xf32>
    %315 = math.exp %314 : vector<16x128xf32>
    %cst_122 = arith.constant 1.000000e+00 : f32
    %316 = vector.broadcast %cst_122 : f32 to vector<16x128xf32>
    %317 = arith.subf %315, %316 : vector<16x128xf32>
    %cst_123 = arith.constant 0.000000e+00 : f32
    %318 = vector.broadcast %cst_123 : f32 to vector<16x128xf32>
    %319 = arith.cmpf ogt, %312, %318 : vector<16x128xf32>
    %cst_124 = arith.constant 1.67326319 : f32
    %320 = vector.broadcast %cst_124 : f32 to vector<16x128xf32>
    %321 = arith.mulf %320, %317 : vector<16x128xf32>
    %322 = arith.select %319, %312, %321 : vector<16x128xi1>, vector<16x128xf32>
    %cst_125 = arith.constant 1.05070102 : f32
    %323 = vector.broadcast %cst_125 : f32 to vector<16x128xf32>
    %324 = arith.mulf %323, %322 : vector<16x128xf32>
    %325 = arith.truncf %324 : vector<16x128xf32> to vector<16x128xbf16>
    %c0_126 = arith.constant 0 : index
    %c0_127 = arith.constant 0 : index
    %c0_128 = arith.constant 0 : index
    %326 = vector.load %arg21[%c0_126, %c0_127, %c0_128] : memref<1x128x32xbf16, #tpu.memory_space<vmem>>, vector<1x128x32xbf16>
    %327 = vector.shape_cast %326 : vector<1x128x32xbf16> to vector<128x32xbf16>
    %cst_129 = arith.constant dense<0.000000e+00> : vector<16x32xf32>
    %328 = tpu.matmul %325, %327, %cst_129 {dimension_numbers = #tpu.dot_dimension_numbers<[1], [0], [0], [1], [0, 0, 1, 1], [], []>} : vector<16x128xbf16>, vector<128x32xbf16>, vector<16x32xf32> -> vector<16x32xf32>
    %c0_130 = arith.constant 0 : index
    %c0_131 = arith.constant 0 : index
    %c0_132 = arith.constant 0 : index
    %329 = vector.load %arg22[%c0_130, %c0_131, %c0_132] : memref<1x1x32xf32, #tpu.memory_space<vmem>>, vector<1x1x32xf32>
    %330 = vector.shape_cast %329 : vector<1x1x32xf32> to vector<1x32xf32>
    %331 = vector.broadcast %330 : vector<1x32xf32> to vector<16x32xf32>
    %332 = arith.addf %328, %331 : vector<16x32xf32>
    %333 = vector.shape_cast %332 : vector<16x32xf32> to vector<2x8x32xf32>
    %334 = arith.addf %275, %333 : vector<2x8x32xf32>
    %c0_133 = arith.constant 0 : index
    %c0_134 = arith.constant 0 : index
    %c0_135 = arith.constant 0 : index
    %335 = vector.load %arg26[%c0_133, %c0_134, %c0_135] : memref<2x8x32xf32, #tpu.memory_space<vmem>>, vector<2x8x32xf32>
    tpu.vector_store %arg26[%c0_133, %c0_134, %c0_135], %334 {strides = array<i32>} : memref<2x8x32xf32, #tpu.memory_space<vmem>>, vector<2x8x32xf32>,
    %c1_i32 = arith.constant 1 : i32
    %336 = arith.cmpi eq, %arg1, %c1_i32 : i32
    %337 = arith.extui %336 : i1 to i32
    %c0_i32_136 = arith.constant 0 : i32
    %338 = arith.cmpi ne, %337, %c0_i32_136 : i32
    scf.if %338 {
      %c0_137 = arith.constant 0 : index
      %c0_138 = arith.constant 0 : index
      %339 = vector.load %arg23[%c0_137, %c0_138] : memref<1x32xf32, #tpu.memory_space<vmem>>, vector<1x32xf32>
      %c0_139 = arith.constant 0 : index
      %c0_140 = arith.constant 0 : index
      %340 = vector.load %arg24[%c0_139, %c0_140] : memref<1x32xf32, #tpu.memory_space<vmem>>, vector<1x32xf32>
      %cst_141 = arith.constant dense<0.000000e+00> : vector<2x8xf32>
      %341 = vector.multi_reduction <add>, %334, %cst_141 [2] : vector<2x8x32xf32> to vector<2x8xf32>
      %342 = vector.shape_cast %341 : vector<2x8xf32> to vector<2x8x1xf32>
      %cst_142 = arith.constant 3.200000e+01 : f32
      %343 = vector.broadcast %cst_142 : f32 to vector<2x8x1xf32>
      %344 = arith.divf %342, %343 : vector<2x8x1xf32>
      %345 = vector.broadcast %344 : vector<2x8x1xf32> to vector<2x8x32xf32>
      %346 = arith.subf %334, %345 : vector<2x8x32xf32>
      %347 = arith.mulf %346, %346 : vector<2x8x32xf32>
      %cst_143 = arith.constant dense<0.000000e+00> : vector<2x8xf32>
      %348 = vector.multi_reduction <add>, %347, %cst_143 [2] : vector<2x8x32xf32> to vector<2x8xf32>
      %349 = vector.shape_cast %348 : vector<2x8xf32> to vector<2x8x1xf32>
      %cst_144 = arith.constant 3.100000e+01 : f32
      %350 = vector.broadcast %cst_144 : f32 to vector<2x8x1xf32>
      %351 = arith.divf %349, %350 : vector<2x8x1xf32>
      %352 = math.sqrt %351 : vector<2x8x1xf32>
      %cst_145 = arith.constant 9.99999997E-7 : f32
      %353 = vector.broadcast %cst_145 : f32 to vector<2x8x1xf32>
      %354 = arith.addf %352, %353 : vector<2x8x1xf32>
      %cst_146 = arith.constant 1.000000e+00 : f32
      %355 = vector.broadcast %cst_146 : f32 to vector<2x8x1xf32>
      %356 = arith.divf %355, %354 : vector<2x8x1xf32>
      %357 = vector.broadcast %356 : vector<2x8x1xf32> to vector<2x8x32xf32>
      %358 = arith.mulf %346, %357 : vector<2x8x32xf32>
      %359 = vector.shape_cast %339 : vector<1x32xf32> to vector<1x1x32xf32>
      %360 = vector.broadcast %359 : vector<1x1x32xf32> to vector<2x8x32xf32>
      %361 = arith.mulf %360, %358 : vector<2x8x32xf32>
      %362 = vector.shape_cast %340 : vector<1x32xf32> to vector<1x1x32xf32>
      %363 = vector.broadcast %362 : vector<1x1x32xf32> to vector<2x8x32xf32>
      %364 = arith.addf %361, %363 : vector<2x8x32xf32>
      %c0_147 = arith.constant 0 : index
      %c0_148 = arith.constant 0 : index
      %c0_149 = arith.constant 0 : index
      %365 = vector.load %arg25[%c0_147, %c0_148, %c0_149] : memref<2x8x32xf32, #tpu.memory_space<vmem>>, vector<2x8x32xf32>
      tpu.vector_store %arg25[%c0_147, %c0_148, %c0_149], %364 {strides = array<i32>} : memref<2x8x32xf32, #tpu.memory_space<vmem>>, vector<2x8x32xf32>,
    } else {
    }
    return
  }
  func.func @transform_0(%arg0: i32, %arg1: i32) -> (i32, i32, i32) {
    %c0_i32 = arith.constant 0 : i32
    %c0_i32_0 = arith.constant 0 : i32
    %c0_i32_1 = arith.constant 0 : i32
    return %arg0, %c0_i32, %c0_i32_0 : i32, i32, i32
  }
  func.func @transform_1(%arg0: i32, %arg1: i32) -> (i32, i32) {
    %c0_i32 = arith.constant 0 : i32
    %c0_i32_0 = arith.constant 0 : i32
    %c0_i32_1 = arith.constant 0 : i32
    return %c0_i32, %c0_i32_0 : i32, i32
  }
  func.func @transform_2(%arg0: i32, %arg1: i32) -> (i32, i32, i32) {
    %c0_i32 = arith.constant 0 : i32
    %c0_i32_0 = arith.constant 0 : i32
    %c0_i32_1 = arith.constant 0 : i32
    return %arg0, %c0_i32, %c0_i32_0 : i32, i32, i32
  }
  func.func @transform_3(%arg0: i32, %arg1: i32) -> (i32, i32, i32) {
    %c0_i32 = arith.constant 0 : i32
    %c0_i32_0 = arith.constant 0 : i32
    %c0_i32_1 = arith.constant 0 : i32
    return %arg1, %c0_i32, %c0_i32_0 : i32, i32, i32
  }
  func.func @transform_4(%arg0: i32, %arg1: i32) -> (i32, i32, i32) {
    %c0_i32 = arith.constant 0 : i32
    %c0_i32_0 = arith.constant 0 : i32
    %c0_i32_1 = arith.constant 0 : i32
    return %arg1, %c0_i32, %c0_i32_0 : i32, i32, i32
  }
  func.func @transform_5(%arg0: i32, %arg1: i32) -> (i32, i32, i32) {
    %c0_i32 = arith.constant 0 : i32
    %c0_i32_0 = arith.constant 0 : i32
    %c0_i32_1 = arith.constant 0 : i32
    return %arg1, %c0_i32, %c0_i32_0 : i32, i32, i32
  }
  func.func @transform_6(%arg0: i32, %arg1: i32) -> (i32, i32, i32) {
    %c0_i32 = arith.constant 0 : i32
    %c0_i32_0 = arith.constant 0 : i32
    %c0_i32_1 = arith.constant 0 : i32
    return %arg1, %c0_i32, %c0_i32_0 : i32, i32, i32
  }
  func.func @transform_7(%arg0: i32, %arg1: i32) -> (i32, i32, i32) {
    %c0_i32 = arith.constant 0 : i32
    %c0_i32_0 = arith.constant 0 : i32
    %c0_i32_1 = arith.constant 0 : i32
    return %arg1, %c0_i32, %c0_i32_0 : i32, i32, i32
  }
  func.func @transform_8(%arg0: i32, %arg1: i32) -> (i32, i32, i32) {
    %c0_i32 = arith.constant 0 : i32
    %c0_i32_0 = arith.constant 0 : i32
    %c0_i32_1 = arith.constant 0 : i32
    return %arg1, %c0_i32, %c0_i32_0 : i32, i32, i32
  }
  func.func @transform_9(%arg0: i32, %arg1: i32) -> (i32, i32, i32) {
    %c0_i32 = arith.constant 0 : i32
    %c0_i32_0 = arith.constant 0 : i32
    %c0_i32_1 = arith.constant 0 : i32
    return %arg1, %c0_i32, %c0_i32_0 : i32, i32, i32
  }
  func.func @transform_10(%arg0: i32, %arg1: i32) -> (i32, i32, i32) {
    %c0_i32 = arith.constant 0 : i32
    %c0_i32_0 = arith.constant 0 : i32
    %c0_i32_1 = arith.constant 0 : i32
    return %arg1, %c0_i32, %c0_i32_0 : i32, i32, i32
  }
  func.func @transform_11(%arg0: i32, %arg1: i32) -> (i32, i32, i32) {
    %c0_i32 = arith.constant 0 : i32
    %c0_i32_0 = arith.constant 0 : i32
    %c0_i32_1 = arith.constant 0 : i32
    return %arg1, %c0_i32, %c0_i32_0 : i32, i32, i32
  }
  func.func @transform_12(%arg0: i32, %arg1: i32) -> (i32, i32, i32) {
    %c0_i32 = arith.constant 0 : i32
    %c0_i32_0 = arith.constant 0 : i32
    %c0_i32_1 = arith.constant 0 : i32
    return %arg1, %c0_i32, %c0_i32_0 : i32, i32, i32
  }
  func.func @transform_13(%arg0: i32, %arg1: i32) -> (i32, i32, i32) {
    %c0_i32 = arith.constant 0 : i32
    %c0_i32_0 = arith.constant 0 : i32
    %c0_i32_1 = arith.constant 0 : i32
    return %arg1, %c0_i32, %c0_i32_0 : i32, i32, i32
  }
  func.func @transform_14(%arg0: i32, %arg1: i32) -> (i32, i32, i32) {
    %c0_i32 = arith.constant 0 : i32
    %c0_i32_0 = arith.constant 0 : i32
    %c0_i32_1 = arith.constant 0 : i32
    return %arg1, %c0_i32, %c0_i32_0 : i32, i32, i32
  }
  func.func @transform_15(%arg0: i32, %arg1: i32) -> (i32, i32, i32) {
    %c0_i32 = arith.constant 0 : i32
    %c0_i32_0 = arith.constant 0 : i32
    %c0_i32_1 = arith.constant 0 : i32
    return %arg1, %c0_i32, %c0_i32_0 : i32, i32, i32
  }
  func.func @transform_16(%arg0: i32, %arg1: i32) -> (i32, i32, i32) {
    %c0_i32 = arith.constant 0 : i32
    %c0_i32_0 = arith.constant 0 : i32
    %c0_i32_1 = arith.constant 0 : i32
    return %arg1, %c0_i32, %c0_i32_0 : i32, i32, i32
  }
  func.func @transform_17(%arg0: i32, %arg1: i32) -> (i32, i32, i32) {
    %c0_i32 = arith.constant 0 : i32
    %c0_i32_0 = arith.constant 0 : i32
    %c0_i32_1 = arith.constant 0 : i32
    return %arg1, %c0_i32, %c0_i32_0 : i32, i32, i32
  }
  func.func @transform_18(%arg0: i32, %arg1: i32) -> (i32, i32, i32) {
    %c0_i32 = arith.constant 0 : i32
    %c0_i32_0 = arith.constant 0 : i32
    %c0_i32_1 = arith.constant 0 : i32
    return %arg1, %c0_i32, %c0_i32_0 : i32, i32, i32
  }
  func.func @transform_19(%arg0: i32, %arg1: i32) -> (i32, i32, i32) {
    %c0_i32 = arith.constant 0 : i32
    %c0_i32_0 = arith.constant 0 : i32
    %c0_i32_1 = arith.constant 0 : i32
    return %arg1, %c0_i32, %c0_i32_0 : i32, i32, i32
  }
  func.func @transform_20(%arg0: i32, %arg1: i32) -> (i32, i32, i32) {
    %c0_i32 = arith.constant 0 : i32
    %c0_i32_0 = arith.constant 0 : i32
    %c0_i32_1 = arith.constant 0 : i32
    return %arg1, %c0_i32, %c0_i32_0 : i32, i32, i32
  }
  func.func @transform_21(%arg0: i32, %arg1: i32) -> (i32, i32) {
    %c0_i32 = arith.constant 0 : i32
    %c0_i32_0 = arith.constant 0 : i32
    %c0_i32_1 = arith.constant 0 : i32
    return %c0_i32, %c0_i32_0 : i32, i32
  }
  func.func @transform_22(%arg0: i32, %arg1: i32) -> (i32, i32) {
    %c0_i32 = arith.constant 0 : i32
    %c0_i32_0 = arith.constant 0 : i32
    %c0_i32_1 = arith.constant 0 : i32
    return %c0_i32, %c0_i32_0 : i32, i32
  }
  func.func @transform_23(%arg0: i32, %arg1: i32) -> (i32, i32, i32) {
    %c0_i32 = arith.constant 0 : i32
    %c0_i32_0 = arith.constant 0 : i32
    %c0_i32_1 = arith.constant 0 : i32
    return %arg0, %c0_i32, %c0_i32_0 : i32, i32, i32
  }
}

</mosaic_0001>

<bundles_post_ra>
// kernel: transformer_local_forward.1
= control target key start
LH: loop header
LB: loop body
LE: loop exit
PB: predicated region body
PF: predicated region fallthrough
CT: control target
= control target key end

     0   :  { %s4238_s0 = inlined_call_operand.vmem [shape: f32[2,8,32], index: 0, kind: input, shape index: {}]   ;;  %s4239_s1 = inlined_call_operand.vmem [shape: f32[8,32], index: 1, kind: input, shape index: {}]   ;;  %s4240_s2 = inlined_call_operand.vmem [shape: f32[2,1,8], index: 2, kind: input, shape index: {}]   ;;  %s4241_s3 = inlined_call_operand.vmem [shape: f32[2,1,32], index: 3, kind: input, shape index: {}]   ;;  %s4242_s4 = inlined_call_operand.vmem [shape: f32[2,1,32], index: 4, kind: input, shape index: {}]   ;;  %s4243_s5 = inlined_call_operand.vmem [shape: bf16[2,32,32], index: 5, kind: input, shape index: {}]   ;;  %s4244_s6 = inlined_call_operand.vmem [shape: f32[2,1,32], index: 6, kind: input, shape index: {}]   ;;  %s4245_s7 = inlined_call_operand.vmem [shape: bf16[2,32,32], index: 7, kind: input, shape index: {}]   ;;  %s4246_s8 = inlined_call_operand.vmem [shape: f32[2,1,32], index: 8, kind: input, shape index: {}]   ;;  %s4247_s9 = inlined_call_operand.vmem [shape: bf16[2,32,32], index: 9, kind: input, shape index: {}]   ;;  %s4248_s10 = inlined_call_operand.vmem [shape: f32[2,1,32], index: 10, kind: input, shape index: {}]   ;;  %s4249_s11 = inlined_call_operand.vmem [shape: bf16[2,96,32], index: 11, kind: input, shape index: {}]   ;;  %s4250_s12 = inlined_call_operand.vmem [shape: f32[2,1,32], index: 12, kind: input, shape index: {}]   ;;  %s4251_s13 = inlined_call_operand.vmem [shape: bf16[2,32,32], index: 13, kind: input, shape index: {}]   ;;  %s4252_s14 = inlined_call_operand.vmem [shape: f32[2,1,32], index: 14, kind: input, shape index: {}]   ;;  %s4253_s15 = inlined_call_operand.vmem [shape: f32[2,1,32], index: 15, kind: input, shape index: {}]   ;;  %s4254_s16 = inlined_call_operand.vmem [shape: f32[2,1,32], index: 16, kind: input, shape index: {}]   ;;  %s4255_s17 = inlined_call_operand.vmem [shape: bf16[2,32,128], index: 17, kind: input, shape index: {}]   ;;  %s4256_s18 = inlined_call_operand.vmem [shape: f32[2,1,128], index: 18, kind: input, shape index: {}]   ;;  %s4257_s19 = inlined_call_operand.vmem [shape: bf16[2,128,32], index: 19, kind: input, shape index: {}]   ;;  %s4258_s20 = inlined_call_operand.vmem [shape: f32[2,1,32], index: 20, kind: input, shape index: {}]   ;;  %s4259_s21 = inlined_call_operand.vmem [shape: f32[1,32], index: 21, kind: input, shape index: {}]   ;;  %s4260_s22 = inlined_call_operand.vmem [shape: f32[1,32], index: 22, kind: input, shape index: {}]   ;;  %s4261_s23 = inlined_call_operand.hbm [shape: f32[2,8,32], index: 23, kind: output, shape index: {}]  }
   0x1   :  { %4269 = sst [smem:[#allocation12_spill]] %s4238_s0 }
   0x2   :  { %4270 = sst [smem:[#allocation13_spill]] %s4239_s1 }
   0x3   :  { %4271 = sst [smem:[#allocation14_spill]] %s4240_s2 }
   0x4   :  { %4272 = sst [smem:[#allocation15_spill]] %s4241_s3 }
   0x5   :  { %4273 = sst [smem:[#allocation16_spill]] %s4242_s4 }
   0x6   :  { %4274 = sst [smem:[#allocation17_spill]] %s4243_s5 }
   0x7   :  { %4275 = sst [smem:[#allocation18_spill]] %s4244_s6 }
   0x8   :  { %4276 = sst [smem:[#allocation19_spill]] %s4245_s7 }
   0x9   :  { %4277 = sst [smem:[#allocation20_spill]] %s4247_s9 }
   0xa   :  { %4278 = sst [smem:[#allocation21_spill]] %s4249_s11 }
   0xb   :  { %4279 = sst [smem:[#allocation22_spill]] %s4251_s13 }
   0xc   :  { %4280 = sst [smem:[#allocation23_spill]] %s4253_s15 }
   0xd   :  { %4281 = sst [smem:[#allocation24_spill]] %s4257_s19 }
   0xe   :  { %4282 = sst [smem:[#allocation25_spill]] %s4259_s21 }
   0xf   :  { %4283 = sst [smem:[#allocation26_spill]] %s4260_s22 }
  0x10   :  { %4284 = sst [smem:[#allocation27_spill]] %s4261_s23 }
  0x11   :  { %28 = vsyncpa [#allocation5], 0  ;;  %s3727_s4 = smov 0   ;;  %s3729_s30 = smov 0  }
  0x12   :  { %s3731_s24 = smov 0  }
  0x13 LB: > { %4285 = sst [smem:[#allocation7_spill]] %s3584_s4  ;;  %s43_s5 = sadd.s32 1, %s3588_s30  ;;  %s3592_s24 = sphi %s3731_s24, %s34_s24   ;;  %s3588_s30 = sphi %s3729_s30, %s4330_s30   ;;  %s3584_s4 = sphi %s3727_s4, %s4329_s4  }
  0x14   : > { %4286 = sst [smem:[#allocation8_spill]] %s3588_s30  ;;  %p44_p0 = scmp.ge.s32.totalorder %s43_s5, 2 }
  0x15   : > { %4287 = sst [smem:[#allocation9_spill]] %s3592_s24  ;;  %p3064_p1 = scmp.ge.s32.totalorder %s3592_s24, 1 }
  0x16   : > { %p819_p2 = scmp.lt.s32.totalorder %s3592_s24, 3  ;;  %s4332_s5 = smov (%p44_p0, %s43_s5), 0 }
  0x17   : > { %4288 = sst [smem:[#allocation10_spill]] %s4332_s5 }
  0x18   : > { %p820_p3 = pnand %p3064_p1, %p819_p2 }
  0x1a   : > { %823 = sbr.rel (%p820_p3) target bundleno = 3074 (0xc02), region = 112 }
  0x21   : > { %p961_p4 = scmp.lt.s32.totalorder %s3584_s4, 1  ;;  %s4292_s24 = sld [smem:[#allocation17_spill]] }
  0x22   : > { %s4293_s6 = sld [smem:[#allocation19_spill]]  ;;  %s4295_s9 = sld [smem:[#allocation20_spill]] }
  0x23   : > { %s3750_s1 = scalar_select %p961_p4, %s3584_s4, 1 }
  0x24   : > { %s4296_s13 = sld [smem:[#allocation22_spill]]  ;;  %s4297_s11 = sld [smem:[#allocation21_spill]] }
  0x25   : > { %s3152_s0 = sshll.u32 %s3750_s1, 4  ;;  %s3400_s30 = smul.u32 48, %s3750_s1 }
  0x26   : > { %s1028_s5 = scalar_lea.vmem %s4258_s20, %s3750_s1  ;;  %s4300_s2 = sld [smem:[#allocation7_spill]] }
  0x27   : > { %s3768_s22 = scalar_lea.vmem %s4292_s24, %s3152_s0 }
  0x28   : > { %s3773_s27 = scalar_lea.vmem %s4293_s6, %s3152_s0  ;;  %s3782_s25 = scalar_lea.vmem %s4295_s9, %s3152_s0 }
  0x29   : > { %4294 = sst [smem:[#allocation11_spill]] %s3773_s27 }
  0x2a   : > { %s3796_s27 = scalar_lea.vmem %s4296_s13, %s3152_s0  ;;  %s3801_s19 = scalar_lea.vmem %s4297_s11, %s3400_s30 }
  0x2b   : > { %s3818_s13 = scalar_lea.vmem %s4255_s17, %s3152_s0  ;;  %s3157_s11 = sshll.u32 %s3750_s1, 6 }
  0x2c   : > { %s4299_s9 = sld [smem:[#allocation24_spill]]  ;;  %p3078_p5 = scmp.ne.s32.totalorder %s4300_s2, 0 }
  0x2d   : > { %s4301_s4 = sld [smem:[#allocation12_spill]] (!%p3078_p5)  ;;  %s4303_s30 = sld [smem:[#allocation13_spill]] (!%p3078_p5)  ;;  %vm1040_vm0 = vcmask (!%p3078_p5), 261120   ;;  %v3594_v5 = vmov (!%p3078_p5), 0.0  }
  0x2e   : > { %1034 = sbr.rel (%p3078_p5) target bundleno = 56 (0x38), region = 116  ;;  %1043 = vst.msk [vmem:[#allocation3] sm:$0xff] (!%p3078_p5), %vm1040_vm0, %v3594_v5  ;;  %1044 = vst.msk [vmem:[#allocation3 + $0x18] sm:$0xff] (!%p3078_p5), %vm1040_vm0, %v3594_v5 }
  0x2f   : > { %1045 = vst.msk [vmem:[#allocation3 + $0x10] sm:$0xff] (!%p3078_p5), %vm1040_vm0, %v3594_v5  ;;  %1046 = vst.msk [vmem:[#allocation3 + $0x28] sm:$0xff] (!%p3078_p5), %vm1040_vm0, %v3594_v5 }
  0x32   : > { %s3832_s15 = scalar_lea.vmem %s4299_s9, %s3157_s11 }
  0x33   : > { %s4302_s6 = smov (!%p3078_p5), %s4301_s4  ;;  %v1035_v0 = vld [vmem:[%s4301_s4] sm:$0xff] (!%p3078_p5) }
  0x34   : > { %v1037_v1 = vld [vmem:[%s4303_s30] sm:$0xff] (!%p3078_p5)  ;;  %v1036_v2 = vld [vmem:[%s4302_s6 + $0x8] sm:$0xff] (!%p3078_p5) }
  0x35   : > { %v1038_v3 = vadd.f32 %v1037_v1, %v1035_v0  ;;  %v1039_v4 = vadd.f32 %v1037_v1, %v1036_v2 }
  0x37   : > { %1041 = vst.msk [vmem:[#allocation2] sm:$0xff] %vm1040_vm0, %v1038_v3  ;;  %1042 = vst.msk [vmem:[#allocation2 + $0x8] sm:$0xff] %vm1040_vm0, %v1039_v4 }
  0x38 PF: > { %vm1057_vm1 = vcmask 261120   ;;  %v3454_v20 = vld [vmem:[%s3768_s22] sm:$0xff]   ;;  %v3595_v21 = vmov 0.0   ;;  %vm3596_vm2 = vmmov 0   ;;  %v3455_v22 = vld [vmem:[%s3768_s22 + $0x8] sm:$0xff]   ;;  %s4304_s9 = sld [smem:[#allocation11_spill]]  ;;  %s4311_s29 = scalar_lea.vmem %s4246_s8, %s3750_s1 }
  0x39   : > { %3228 = vmatprep.subr.bf16.mxu1 %v3595_v21  ;;  %3232 = vmatprep.mubr.msk.bf16.mxu1 %vm3596_vm2, %v3595_v21  ;;  %s4305_s21 = sld [smem:[#allocation15_spill]]  ;;  %s4307_s26 = sld [smem:[#allocation16_spill]]  ;;  %v3458_v52 = vld [vmem:[%s3782_s25] sm:$0xff]   ;;  %v3459_v53 = vld [vmem:[%s3782_s25 + $0x8] sm:$0xff]   ;;  %vm1342_vm7 = vcmask 64512   ;;  %vm1405_vm8 = vcmask 1043456  }
  0x3a   : > { %3229 = vmatpush3.bf16.msra.mxu1 %v3454_v20  ;;  %3258 = vmatprep.subr.bf16.mxu0 %v3595_v21  ;;  %s4309_s4 = sld [smem:[#allocation18_spill]]  ;;  %v3086_v62 = vld [vmem:[%s4311_s29] ss:$0 sm:$0xff]  ;;  %s3598_s11 = smov 112   ;;  %vm2284_vm11 = vcmask 523264   ;;  %vm2349_vm12 = vcmask 785408  }
  0x3b   : > { %3230 = vmatprep.subr.bf16.mxu1 %v3595_v21  ;;  %3260 = vmatprep.mubr.msk.bf16.mxu0 %vm3596_vm2, %v3595_v21  ;;  %s3599_s3 = smov 104   ;;  %s3603_s25 = smov 16   ;;  %vm1796_vm13 = vcmask 130048   ;;  %vm1798_vm14 = vcmask 195584  }
  0x3c   : > { %s3604_s30 = smov 24   ;;  %s4318_s0 = scalar_lea.vmem %s4254_s16, %s3750_s1 }
  0x3d   : > { %s4320_s29 = sld [smem:[#allocation7_spill]] }
  0x3e   : > { %v1047_v6 = vld [vmem:[#allocation2] sm:$0xff]  ;;  %v1048_v7 = vld [vmem:[#allocation2 + $0x8] sm:$0xff]  ;;  %3231 = vmatpush3.bf16.msra.mxu1 %v3455_v22 }
  0x3f   : > { %v1058_v8 = vsel %vm1057_vm1, %v1047_v6, 0.0  ;;  %v1061_v9 = vsel %vm1057_vm1, %v1048_v7, 0.0  ;;  %3236 = vmatprep.subr.bf16.mxu1 %v3595_v21  ;;  %s4306_s28 = scalar_lea.vmem %s4305_s21, %s3750_s1  ;;  %s4308_s2 = scalar_lea.vmem %s4307_s26, %s3750_s1  ;;  %v3456_v49 = vld [vmem:[%s4304_s9] sm:$0xff]   ;;  %v3457_v51 = vld [vmem:[%s4304_s9 + $0x8] sm:$0xff]  }
  0x40   : > { %1059 = vadd.xlane.f32.xlu0 %v1058_v8  ;;  %v3079_v41 = vld [vmem:[%s4306_s28] ss:$0 sm:$0xff]  ;;  %s4310_s7 = scalar_lea.vmem %s4309_s4, %s3750_s1  ;;  %s3597_s9 = smov 120  }
  0x41   : > { %v3080_v45 = vld [vmem:[%s4308_s2] ss:$0 sm:$0xff]  ;;  %s4312_s28 = scalar_lea.vmem %s4248_s10, %s3750_s1  ;;  %s4313_s2 = sld [smem:[#allocation14_spill]] }
  0x42   : > { %v3081_v54 = vld [vmem:[%s4310_s7] ss:$0 sm:$0xff]  ;;  %s3600_s4 = smov 32   ;;  %s3601_s7 = smov 64  }
  0x43   : > { %s4315_s21 = scalar_lea.vmem %s4252_s14, %s3750_s1  ;;  %p3145_p6 = scmp.ne.s32.totalorder %s4320_s29, 1 }
  0x44   : > { %1062 = vadd.xlane.f32.xlu0 %v1061_v9  ;;  %s4322_s22 = sld [smem:[#allocation26_spill]] (!%p3145_p6) }
  0xcd   : > { %v1060_v10 = vpop.xlane.xlu0 %1059 }
  0xce   : > { %v1065_v11 = vmul.f32 0.03125, %v1060_v10 }
  0xd0   : > { %v1067_v12 = vsub.f32 %v1047_v6, %v1065_v11  ;;  %v3090_v6 = vld [vmem:[%s4312_s28] ss:$0 sm:$0xff] }
  0xd1   : > { %v1063_v13 = vpop.xlane.xlu0 %1062 }
  0xd2   : > { %v1066_v14 = vmul.f32 0.03125, %v1063_v13  ;;  %v1069_v15 = vmul.f32 %v1067_v12, %v1067_v12 }
  0xd4   : > { %v1068_v16 = vsub.f32 %v1048_v7, %v1066_v14  ;;  %v1071_v17 = vsel %vm1057_vm1, %v1069_v15, 0.0 }
  0xd5   : > { %1072 = vadd.xlane.f32.xlu1 %v1071_v17 }
  0xd6   : > { %v1070_v18 = vmul.f32 %v1068_v16, %v1068_v16 }
  0xd8   : > { %v1074_v19 = vsel %vm1057_vm1, %v1070_v18, 0.0 }
  0xd9   : > { %1075 = vadd.xlane.f32.xlu1 %v1074_v19 }
 0x162   : > { %v1073_v23 = vpop.xlane.xlu1 %1072 }
 0x163   : > { %v1078_v24 = vmul.f32 0.032258064, %v1073_v23 }
 0x165   : > { %3478 = vrsqrt.f32 %v1078_v24  ;;  %vm1082_vm3 = vcmp.eq.f32.partialorder %v1078_v24, inf  ;;  %v1085_v29 = vand.u32 2147483648, %v1078_v24  ;;  %vm1084_vm4 = vcmp.eq.f32.partialorder %v1078_v24, 0.0 }
 0x166   : > { %v1076_v25 = vpop.xlane.xlu1 %1075 }
 0x167   : > { %v1079_v26 = vmul.f32 0.032258064, %v1076_v25 }
 0x169   : > { %3480 = vrsqrt.f32 %v1079_v26  ;;  %vm1089_vm5 = vcmp.eq.f32.partialorder %v1079_v26, inf  ;;  %v1092_v35 = vand.u32 2147483648, %v1079_v26  ;;  %vm1091_vm6 = vcmp.eq.f32.partialorder %v1079_v26, 0.0 }
 0x16f   : > { %v3479_v27 = vpop.eup %3478 }
 0x170   : > { %v1081_v28 = vmul.f32 %v3479_v27, %v1078_v24 }
 0x172   : > { %v1083_v30 = vsel %vm1082_vm3, %v1078_v24, %v1081_v28 }
 0x173   : > { %v3481_v31 = vpop.eup %3480  ;;  %v1086_v32 = vsel %vm1084_vm4, %v1085_v29, %v1083_v30 }
 0x174   : > { %v1094_v33 = vadd.f32 1e-06, %v1086_v32  ;;  %v1088_v34 = vmul.f32 %v3481_v31, %v1079_v26 }
 0x176   : > { %3482 = vrcp.f32 %v1094_v33  ;;  %v1090_v36 = vsel %vm1089_vm5, %v1079_v26, %v1088_v34 }
 0x177   : > { %v1093_v37 = vsel %vm1091_vm6, %v1092_v35, %v1090_v36 }
 0x178   : > { %v1095_v38 = vadd.f32 1e-06, %v1093_v37 }
 0x17a   : > { %3484 = vrcp.f32 %v1095_v38 }
 0x180   : > { %v3483_v39 = vpop.eup %3482 }
 0x181   : > { %v1100_v40 = vmul.f32 %v3483_v39, %v1067_v12 }
 0x183   : > { %v1108_v44 = vmul.f32 %v3079_v41, %v1100_v40 }
 0x184   : > { %v3485_v42 = vpop.eup %3484 }
 0x185   : > { %v1101_v43 = vmul.f32 %v3485_v42, %v1068_v16  ;;  %v1116_v47 = vadd.f32 %v3080_v45, %v1108_v44  ;;  %v1049_v42 = vld [vmem:[%s4313_s2] sm:$0x1] }
 0x186   : > { %vm1051_vm9 = vcmp.eq.f32.partialorder %v1049_v42, 0.0 }
 0x187   : > { %v1109_v46 = vmul.f32 %v3079_v41, %v1101_v43  ;;  %v1337_v41 = vlaneseq }
 0x189   : > { %v1117_v48 = vadd.f32 %v3080_v45, %v1109_v46  ;;  %v1338_v43 = vshrl.u32 %v1337_v41, 7  ;;  %v1053_v45 = vsel %vm1051_vm9, -1e+09, %v3595_v21 }
 0x18b   : > { %v3158_v50 = vpack.c.bf16 %v1117_v48, %v1116_v47  ;;  %v1339_v44 = vsub.s32 0, %v1338_v43 }
 0x18d   : > { %3233 = vmatmul.mubr.msk.bf16.vlgmr.msra.gmra.mrb[0].mxu1 %vm1057_vm1, %v3158_v50  ;;  %v1340_v46 = vrot.slane %v1053_v45, %v1339_v44 }
 0x18e   : > { %3237 = vmatpush3.bf16.msra.mxu1 %v3456_v49  ;;  %3240 = vmatprep.mubr.msk.bf16.mxu1 %vm3596_vm2, %v3595_v21 }
 0x18f   : > { %3238 = vmatprep.subr.bf16.mxu1 %v3595_v21 }
 0x192   : > { %3239 = vmatpush3.bf16.msra.mxu1 %v3457_v51 }
 0x193   : > { %3244 = vmatprep.subr.bf16.mxu1 %v3595_v21 }
 0x195   : > { %3241 = vmatmul.mubr.msk.bf16.vlgmr.msra.gmra.mrb[4].mxu1 %vm1057_vm1, %v3158_v50 }
 0x196   : > { %3245 = vmatpush3.bf16.msra.mxu1 %v3458_v52  ;;  %3248 = vmatprep.mubr.msk.bf16.mxu1 %vm3596_vm2, %v3595_v21 }
 0x197   : > { %3246 = vmatprep.subr.bf16.mxu1 %v3595_v21 }
 0x19a   : > { %3247 = vmatpush3.bf16.msra.mxu1 %v3459_v53 }
 0x19b   : > { %3252 = vmatprep.subr.bf16.mxu1 %v3595_v21 }
 0x19d   : > { %3249 = vmatmul.mubr.msk.bf16.vlgmr.msra.gmra.mrb[8].mxu1 %vm1057_vm1, %v3158_v50 }
 0x19e   : > { %3254 = vmatprep.mubr.msk.bf16.mxu1 %vm3596_vm2, %v3595_v21 }
 0x260   : > { %v1185_v55 = vpop.f32.mrb[0].mxu1 }
 0x261   : > { %v1186_v56 = vadd.f32 %v3081_v54, %v1185_v55  ;;  %v3234_v57 = vpop.f32.mrb[1].mxu1 }
 0x262   : > { %v1188_v58 = vpop.f32.mrb[2].mxu1 }
 0x263   : > { %v1320_v59 = vmul.f32 0.35355338, %v1186_v56  ;;  %v3235_v60 = vpop.f32.mrb[3].mxu1  ;;  %v1189_v7 = vadd.f32 %v3081_v54, %v1188_v58 }
 0x265   : > { %v3159_v61 = vpack.c.bf16 %v1320_v59, %v1320_v59  ;;  %v1321_v13 = vmul.f32 0.35355338, %v1189_v7 }
 0x267   : > { %1449 = vrot.lane.b32.xlu1 %v3159_v61, %s3597_s9  ;;  %v3160_v20 = vpack.c.bf16 %v1321_v13, %v1321_v13 }
 0x268   : > { %v1249_v63 = vpop.f32.mrb[4].mxu1 }
 0x269   : > { %v1250_v0 = vadd.f32 %v3086_v62, %v1249_v63  ;;  %v3242_v1 = vpop.f32.mrb[5].mxu1 }
 0x26a   : > { %v1252_v2 = vpop.f32.mrb[6].mxu1  ;;  %v1050_v1 = vld [vmem:[%s4313_s2 + $0x1] sm:$0x1] }
 0x26b   : > { %v3161_v3 = vpack.c.bf16 %v1250_v0, %v1250_v0  ;;  %v3243_v4 = vpop.f32.mrb[7].mxu1  ;;  %v1253_v8 = vadd.f32 %v3086_v62, %v1252_v2  ;;  %vm1052_vm10 = vcmp.eq.f32.partialorder %v1050_v1, 0.0 }
 0x26d   : > { %1563 = vrot.lane.b32.xlu1 %v3161_v3, %s3598_s11  ;;  %1451 = vrot.lane.b32.xlu0 %v3161_v3, %s3597_s9  ;;  %v1347_v5 = vsel %vm1342_vm7, %v3161_v3, 0  ;;  %v3162_v17 = vpack.c.bf16 %v1253_v8, %v1253_v8 }
 0x26e   : > { %3253 = vmatpush3.bf16.xpose.msra.mxu1 %v1347_v5 }
 0x26f   : > { %3264 = vmatprep.subr.bf16.mxu1 %v3595_v21  ;;  %v1810_v31 = vsel %vm1342_vm7, %v3162_v17, 0 }
 0x270   : > { %v1313_v9 = vpop.f32.mrb[8].mxu1 }
 0x271   : > { %v3905_v10 = vadd.f32 %v3090_v6, %v1313_v9  ;;  %1561 = vrot.lane.b32.xlu1 %v3159_v61, %s3598_s11  ;;  %1674 = vrot.lane.b32.xlu0 %v3161_v3, %s3599_s3  ;;  %v3250_v11 = vpop.f32.mrb[9].mxu1 }
 0x272   : > { %v1316_v12 = vpop.f32.mrb[10].mxu1 }
 0x273   : > { %v3911_v14 = vpack.c.bf16 %v3905_v10, %v3905_v10  ;;  %2260 = vst.msk [vmem:[#allocation3 + $0x8] sm:$0xff] %vm1057_vm1, %v3905_v10  ;;  %v3915_v15 = vadd.f32 %v3090_v6, %v1316_v12  ;;  %v3251_v16 = vpop.f32.mrb[11].mxu1  ;;  %v1054_v6 = vsel %vm1052_vm10, -1e+09, %v3595_v21 }
 0x274   : > { %v1804_v9 = vrot.slane %v1054_v6, %v1339_v44 }
 0x275   : > { %2261 = vst.msk [vmem:[#allocation3 + $0x20] sm:$0xff] %vm1057_vm1, %v3915_v15  ;;  %1672 = vrot.lane.b32.xlu1 %v3159_v61, %s3599_s3  ;;  %3255 = vmatmul.mubr.msk.bf16.vlgmr.msra.gmra.mrb[12].mxu1 %vm1342_vm7, %v3159_v61  ;;  %v1407_v18 = vsel %vm1405_vm8, %v3911_v14, 0  ;;  %v3444_v19 = vpack.i.bf16 %v3915_v15, %v3905_v10 }
 0x276   : > { %1913 = vrot.lane.b32.xlu0 %v3162_v17, %s3597_s9  ;;  %3259 = vmatpush3.bf16.msra.mxu0 %v1407_v18 }
 0x277   : > { %3266 = vmatprep.mubr.msk.bf16.mxu1 %vm3596_vm2, %v3595_v21  ;;  %3270 = vmatprep.subr.bf16.mxu0 %v3595_v21 }
 0x279   : > { %1911 = vrot.lane.b32.xlu1 %v3160_v20, %s3597_s9 }
 0x27a   : > { %2025 = vrot.lane.b32.xlu0 %v3162_v17, %s3598_s11 }
 0x27d   : > { %2023 = vrot.lane.b32.xlu1 %v3160_v20, %s3598_s11 }
 0x27e   : > { %2136 = vrot.lane.b32.xlu0 %v3162_v17, %s3599_s3 }
 0x281   : > { %2134 = vrot.lane.b32.xlu1 %v3160_v20, %s3599_s3 }
 0x2d9   : > { %v1450_v24 = vpop.permute.xlu1 %1449 }
 0x2df   : > { %v1452_v22 = vpop.permute.xlu0 %1451  ;;  %v1564_v25 = vpop.permute.xlu1 %1563 }
 0x2e0   : > { %v1457_v23 = vsel %vm1342_vm7, %v1452_v22, 0  ;;  %v1569_v26 = vsel %vm1342_vm7, %v1564_v25, 0 }
 0x2e1   : > { %3265 = vmatpush3.bf16.xpose.msra.mxu1 %v1457_v23 }
 0x2e2   : > { %3276 = vmatprep.subr.bf16.mxu1 %v3595_v21 }
 0x2e3   : > { %v1675_v27 = vpop.permute.xlu0 %1674  ;;  %v1562_v28 = vpop.permute.xlu1 %1561 }
 0x2e4   : > { %v1680_v29 = vsel %vm1342_vm7, %v1675_v27, 0 }
 0x2e7   : > { %v1673_v30 = vpop.permute.xlu1 %1672 }
 0x2e8   : > { %3267 = vmatmul.mubr.msk.bf16.vlgmr.msra.gmra.mrb[16].mxu1 %vm1342_vm7, %v1450_v24  ;;  %v1914_v32 = vpop.permute.xlu0 %1913 }
 0x2e9   : > { %3277 = vmatpush3.bf16.xpose.msra.mxu1 %v1569_v26  ;;  %3278 = vmatprep.mubr.msk.bf16.mxu1 %vm3596_vm2, %v3595_v21  ;;  %v1919_v33 = vsel %vm1342_vm7, %v1914_v32, 0 }
 0x2ea   : > { %3288 = vmatprep.subr.bf16.mxu1 %v3595_v21 }
 0x2eb   : > { %v1912_v35 = vpop.permute.xlu1 %1911 }
 0x2ec   : > { %v2026_v34 = vpop.permute.xlu0 %2025 }
 0x2ed   : > { %v2031_v36 = vsel %vm1342_vm7, %v2026_v34, 0 }
 0x2ef   : > { %v2024_v38 = vpop.permute.xlu1 %2023 }
 0x2f0   : > { %3279 = vmatmul.mubr.msk.bf16.vlgmr.msra.gmra.mrb[20].mxu1 %vm1342_vm7, %v1562_v28  ;;  %v2137_v37 = vpop.permute.xlu0 %2136 }
 0x2f1   : > { %3289 = vmatpush3.bf16.xpose.msra.mxu1 %v1680_v29  ;;  %3290 = vmatprep.mubr.msk.bf16.mxu1 %vm3596_vm2, %v3595_v21  ;;  %v2142_v39 = vsel %vm1342_vm7, %v2137_v37, 0 }
 0x2f2   : > { %3300 = vmatprep.subr.bf16.mxu1 %v3595_v21 }
 0x2f3   : > { %v2135_v40 = vpop.permute.xlu1 %2134 }
 0x2f8   : > { %3291 = vmatmul.mubr.msk.bf16.vlgmr.msra.gmra.mrb[24].mxu1 %vm1342_vm7, %v1673_v30 }
 0x2f9   : > { %3301 = vmatpush3.bf16.xpose.msra.mxu1 %v1810_v31  ;;  %3302 = vmatprep.mubr.msk.bf16.mxu1 %vm3596_vm2, %v3595_v21 }
 0x2fa   : > { %3312 = vmatprep.subr.bf16.mxu1 %v3595_v21 }
 0x300   : > { %3303 = vmatmul.mubr.msk.bf16.vlgmr.msra.gmra.mrb[28].mxu1 %vm1342_vm7, %v3160_v20 }
 0x301   : > { %3313 = vmatpush3.bf16.xpose.msra.mxu1 %v1919_v33  ;;  %3314 = vmatprep.mubr.msk.bf16.mxu1 %vm3596_vm2, %v3595_v21 }
 0x302   : > { %3324 = vmatprep.subr.bf16.mxu1 %v3595_v21 }
 0x308   : > { %3315 = vmatmul.mubr.msk.bf16.vlgmr.msra.gmra.mrb[32].mxu1 %vm1342_vm7, %v1912_v35 }
 0x309   : > { %3325 = vmatpush3.bf16.xpose.msra.mxu1 %v2031_v36  ;;  %3326 = vmatprep.mubr.msk.bf16.mxu1 %vm3596_vm2, %v3595_v21 }
 0x30a   : > { %3336 = vmatprep.subr.bf16.mxu1 %v3595_v21 }
 0x310   : > { %3327 = vmatmul.mubr.msk.bf16.vlgmr.msra.gmra.mrb[36].mxu1 %vm1342_vm7, %v2024_v38 }
 0x311   : > { %3337 = vmatpush3.bf16.xpose.msra.mxu1 %v2142_v39  ;;  %3338 = vmatprep.mubr.msk.bf16.mxu1 %vm3596_vm2, %v3595_v21 }
 0x312   : > { %3348 = vmatprep.subr.bf16.mxu1 %v3595_v21 }
 0x318   : > { %3339 = vmatmul.mubr.msk.bf16.vlgmr.msra.gmra.mrb[40].mxu1 %vm1342_vm7, %v2135_v40 }
 0x319   : > { %3360 = vmatprep.mubr.msk.bf16.mxu1 %vm3596_vm2, %v3595_v21 }
 0x348   : > { %v1383_v47 = vpop.f32.mrb[12].mxu1 }
 0x349   : > { %v1384_v48 = vadd.f32 %v1383_v47, %v1340_v46  ;;  %v3256_v49 = vpop.f32.mrb[13].mxu1 }
 0x34a   : > { %v1386_v50 = vpop.f32.mrb[14].mxu1 }
 0x34b   : > { %v3257_v51 = vpop.f32.mrb[15].mxu1  ;;  %v1389_v52 = vsel %vm1342_vm7, %v1384_v48, -inf }
 0x34c   : > { %1390 = vmax.xlane.f32.xlu0 %v1389_v52 }
 0x3bb   : > { %v1493_v53 = vpop.f32.mrb[16].mxu1 }
 0x3bc   : > { %v3974_v54 = vadd.f32 %v1493_v53, %v1340_v46  ;;  %v3268_v55 = vpop.f32.mrb[17].mxu1 }
 0x3bd   : > { %v1496_v56 = vpop.f32.mrb[18].mxu1 }
 0x3be   : > { %v3269_v57 = vpop.f32.mrb[19].mxu1  ;;  %v1499_v58 = vsel %vm1342_vm7, %v3974_v54, -inf }
 0x3bf   : > { %1500 = vmax.xlane.f32.xlu1 %v1499_v58 }
 0x3c3   : > { %v1605_v59 = vpop.f32.mrb[20].mxu1 }
 0x3c4   : > { %v1606_v60 = vadd.f32 %v1605_v59, %v1340_v46  ;;  %v3280_v61 = vpop.f32.mrb[21].mxu1 }
 0x3c5   : > { %v1608_v62 = vpop.f32.mrb[22].mxu1 }
 0x3c6   : > { %v3281_v63 = vpop.f32.mrb[23].mxu1  ;;  %v1611_v0 = vsel %vm1342_vm7, %v1606_v60, -inf }
 0x3c7   : > { %1612 = vmax.xlane.f32.xlu0 %v1611_v0 }
 0x3cb   : > { %v1716_v2 = vpop.f32.mrb[24].mxu1 }
 0x3cc   : > { %v1717_v3 = vadd.f32 %v1716_v2, %v1340_v46  ;;  %v3292_v4 = vpop.f32.mrb[25].mxu1  ;;  %v4021_v2 = vpack.c.bf16 %v3915_v15, %v3915_v15 }
 0x3cd   : > { %v1719_v5 = vpop.f32.mrb[26].mxu1 }
 0x3ce   : > { %v3293_v7 = vpop.f32.mrb[27].mxu1  ;;  %v1722_v8 = vsel %vm1342_vm7, %v1717_v3, -inf }
 0x3cf   : > { %1723 = vmax.xlane.f32.xlu0 %v1722_v8 }
 0x3d3   : > { %v1846_v11 = vpop.f32.mrb[28].mxu1 }
 0x3d4   : > { %v1847_v12 = vadd.f32 %v1846_v11, %v1804_v9  ;;  %v3304_v13 = vpop.f32.mrb[29].mxu1 }
 0x3d5   : > { %v1849_v16 = vpop.f32.mrb[30].mxu1 }
 0x3d6   : > { %v3305_v17 = vpop.f32.mrb[31].mxu1  ;;  %v1852_v18 = vsel %vm1342_vm7, %v1847_v12, -inf  ;;  %v3460_v16 = vld [vmem:[%s3801_s19] sm:$0xff]  }
 0x3d7   : > { %1853 = vmax.xlane.f32.xlu0 %v1852_v18  ;;  %3349 = vmatpush3.bf16.msra.mxu1 %v3460_v16  ;;  %v3461_v17 = vld [vmem:[%s3801_s19 + $0x8] sm:$0xff]  }
 0x3d8   : > { %3350 = vmatprep.subr.bf16.mxu1 %v3595_v21 }
 0x3d9   : > { %v1391_v20 = vpop.xlane.xlu0 %1390 }
 0x3da   : > { %v1392_v22 = vsub.f32 %v1384_v48, %v1391_v20 }
 0x3db   : > { %v1955_v23 = vpop.f32.mrb[32].mxu1  ;;  %3351 = vmatpush3.bf16.msra.mxu1 %v3461_v17 }
 0x3dc   : > { %v1393_v24 = vmul.f32 1.442695, %v1392_v22  ;;  %v3985_v25 = vadd.f32 %v1955_v23, %v1804_v9  ;;  %v3316_v26 = vpop.f32.mrb[33].mxu1  ;;  %3352 = vmatprep.subr.bf16.mxu1 %v3595_v21 }
 0x3dd   : > { %v1958_v27 = vpop.f32.mrb[34].mxu1 }
 0x3de   : > { %3486 = vpow2.f32 %v1393_v24  ;;  %v3317_v28 = vpop.f32.mrb[35].mxu1  ;;  %v1961_v29 = vsel %vm1342_vm7, %v3985_v25, -inf }
 0x3df   : > { %1962 = vmax.xlane.f32.xlu1 %v1961_v29  ;;  %v3462_v28 = vld [vmem:[%s3801_s19 + $0x10] sm:$0xff]  }
 0x3e0   : > { %3353 = vmatpush3.bf16.msra.mxu1 %v3462_v28  ;;  %v2265_v29 = vld [vmem:[#allocation3 + $0x21] sm:$0xff] }
 0x3e1   : > { %3354 = vmatprep.subr.bf16.mxu1 %v3595_v21 }
 0x3e3   : > { %v2067_v30 = vpop.f32.mrb[36].mxu1 }
 0x3e4   : > { %v3989_v31 = vadd.f32 %v2067_v30, %v1804_v9  ;;  %v3328_v32 = vpop.f32.mrb[37].mxu1  ;;  %v3463_v30 = vld [vmem:[%s3801_s19 + $0x18] sm:$0xff]  }
 0x3e5   : > { %v2070_v33 = vpop.f32.mrb[38].mxu1  ;;  %3355 = vmatpush3.bf16.msra.mxu1 %v3463_v30 }
 0x3e6   : > { %v3329_v34 = vpop.f32.mrb[39].mxu1  ;;  %v2073_v35 = vsel %vm1342_vm7, %v3989_v31, -inf  ;;  %3356 = vmatprep.subr.bf16.mxu1 %v3595_v21  ;;  %v3464_v33 = vld [vmem:[%s3801_s19 + $0x20] sm:$0xff]  }
 0x3e7   : > { %2074 = vmax.xlane.f32.xlu0 %v2073_v35  ;;  %v3465_v34 = vld [vmem:[%s3801_s19 + $0x28] sm:$0xff]   ;;  %s3602_s19 = smov 8  }
 0x3e8   : > { %v3487_v36 = vpop.eup %3486 }
 0x3e9   : > { %v1395_v37 = vsel %vm1342_vm7, %v3487_v36, 0.0  ;;  %3357 = vmatpush3.bf16.msra.mxu1 %v3464_v33 }
 0x3ea   : > { %3358 = vmatprep.subr.bf16.mxu1 %v3595_v21 }
 0x3eb   : > { %1396 = vadd.xlane.f32.xlu0 %v1395_v37  ;;  %v2178_v38 = vpop.f32.mrb[40].mxu1 }
 0x3ec   : > { %v3994_v39 = vadd.f32 %v2178_v38, %v1804_v9  ;;  %v3340_v40 = vpop.f32.mrb[41].mxu1 }
 0x3ed   : > { %v2181_v41 = vpop.f32.mrb[42].mxu1  ;;  %3359 = vmatpush3.bf16.msra.mxu1 %v3465_v34 }
 0x3ee   : > { %v3341_v42 = vpop.f32.mrb[43].mxu1  ;;  %v2184_v43 = vsel %vm1342_vm7, %v3994_v39, -inf }
 0x3ef   : > { %2185 = vmax.xlane.f32.xlu1 %v2184_v43 }
 0x400   : > { %1513 = vrot.lane.b32.xlu1 %v3911_v14, %s3597_s9 }
 0x401   : > { %1624 = vrot.lane.b32.xlu0 %v3911_v14, %s3598_s11 }
 0x44c   : > { %v1501_v44 = vpop.xlane.xlu1 %1500 }
 0x44d   : > { %v1502_v45 = vsub.f32 %v3974_v54, %v1501_v44 }
 0x44f   : > { %v1503_v46 = vmul.f32 1.442695, %v1502_v45 }
 0x451   : > { %3488 = vpow2.f32 %v1503_v46 }
 0x454   : > { %v1613_v47 = vpop.xlane.xlu0 %1612 }
 0x455   : > { %v1614_v48 = vsub.f32 %v1606_v60, %v1613_v47 }
 0x457   : > { %v1615_v49 = vmul.f32 1.442695, %v1614_v48 }
 0x459   : > { %3490 = vpow2.f32 %v1615_v49  ;;  %v1869_v49 = vsel %vm1405_vm8, %v4021_v2, 0 }
 0x45b   : > { %v4003_v50 = vpop.eup %3488 }
 0x45c   : > { %v1724_v51 = vpop.xlane.xlu0 %1723  ;;  %v1505_v52 = vsel %vm1342_vm7, %v4003_v50, 0.0 }
 0x45d   : > { %v1725_v53 = vsub.f32 %v1717_v3, %v1724_v51  ;;  %1506 = vadd.xlane.f32.xlu1 %v1505_v52 }
 0x45f   : > { %v1726_v55 = vmul.f32 1.442695, %v1725_v53 }
 0x461   : > { %3492 = vpow2.f32 %v1726_v55 }
 0x463   : > { %v4007_v56 = vpop.eup %3490 }
 0x464   : > { %v1854_v57 = vpop.xlane.xlu0 %1853  ;;  %v1617_v54 = vsel %vm1342_vm7, %v4007_v56, 0.0 }
 0x465   : > { %v1855_v58 = vsub.f32 %v1847_v12, %v1854_v57  ;;  %1618 = vadd.xlane.f32.xlu0 %v1617_v54 }
 0x467   : > { %v1856_v59 = vmul.f32 1.442695, %v1855_v58 }
 0x469   : > { %3494 = vpow2.f32 %v1856_v59 }
 0x46b   : > { %v4011_v60 = vpop.eup %3492 }
 0x46c   : > { %v1728_v61 = vsel %vm1342_vm7, %v4011_v60, 0.0  ;;  %v1963_v3 = vpop.xlane.xlu1 %1962 }
 0x46d   : > { %1729 = vadd.xlane.f32.xlu1 %v1728_v61  ;;  %v1964_v13 = vsub.f32 %v3985_v25, %v1963_v3 }
 0x46f   : > { %v1965_v18 = vmul.f32 1.442695, %v1964_v13 }
 0x473   : > { %v4015_v62 = vpop.eup %3494 }
 0x474   : > { %v2075_v63 = vpop.xlane.xlu0 %2074  ;;  %v1858_v0 = vsel %vm1342_vm7, %v4015_v62, 0.0 }
 0x475   : > { %1859 = vadd.xlane.f32.xlu0 %v1858_v0  ;;  %v2076_v11 = vsub.f32 %v3989_v31, %v2075_v63  ;;  %v2264_v31 = vld [vmem:[#allocation3 + $0x9] sm:$0xff]  ;;  %v2263_v63 = vld [vmem:[#allocation3 + $0x1f] sm:$0xff] }
 0x476   : > { %v3449_v32 = vpack.i.bf16 %v2265_v29, %v2264_v31 }
 0x477   : > { %v2077_v12 = vmul.f32 1.442695, %v2076_v11 }
 0x478   : > { %v1397_v1 = vpop.xlane.xlu0 %1396 }
 0x479   : > { %3496 = vrcp.f32 %v1397_v1 }
 0x47a   : > { %3498 = vpow2.f32 %v2077_v12 }
 0x47b   : > { %3500 = vpow2.f32 %v1965_v18 }
 0x47c   : > { %v2186_v4 = vpop.xlane.xlu1 %2185  ;;  %v1625_v10 = vpop.permute.xlu0 %1624 }
 0x47d   : > { %v2187_v20 = vsub.f32 %v3994_v39, %v2186_v4  ;;  %v1630_v38 = vsel %vm1405_vm8, %v1625_v10, 0 }
 0x47e   : > { %1975 = vrot.lane.b32.xlu1 %v4021_v2, %s3597_s9  ;;  %s4321_s9 = sld [smem:[#allocation25_spill]] (!%p3145_p6) }
 0x480   : > { %v1514_v7 = vpop.permute.xlu1 %1513 }
 0x481   : > { %v1519_v9 = vsel %vm1405_vm8, %v1514_v7, 0 }
 0x483   : > { %v3497_v5 = vpop.eup %3496 }
 0x484   : > { %v1400_v6 = vmul.f32 %v3497_v5, %v3487_v36  ;;  %v4039_v22 = vpop.eup %3498 }
 0x485   : > { %v2079_v23 = vsel %vm1342_vm7, %v4039_v22, 0.0  ;;  %v4043_v24 = vpop.eup %3500 }
 0x486   : > { %v1401_v8 = vpack.c.bf16 %v1400_v6, %v1400_v6  ;;  %v1967_v25 = vsel %vm1342_vm7, %v4043_v24, 0.0 }
 0x488   : > { %3261 = vmatmul.mubr.msk.bf16.vlgmr.msra.gmra.mrb[0].mxu0 %vm1342_vm7, %v1401_v8 }
 0x489   : > { %3271 = vmatpush3.bf16.msra.mxu0 %v1519_v9  ;;  %3272 = vmatprep.mubr.msk.bf16.mxu0 %vm3596_vm2, %v3595_v21 }
 0x48a   : > { %3282 = vmatprep.subr.bf16.mxu0 %v3595_v21 }
 0x48b   : > { %1735 = vrot.lane.b32.xlu0 %v3911_v14, %s3599_s3  ;;  %v2188_v14 = vmul.f32 1.442695, %v2187_v20 }
 0x48d   : > { %3502 = vpow2.f32 %v2188_v14 }
 0x497   : > { %v4047_v26 = vpop.eup %3502 }
 0x498   : > { %v2190_v27 = vsel %vm1342_vm7, %v4047_v26, 0.0 }
 0x4a2   : > { %2080 = vadd.xlane.f32.xlu1 %v2079_v23 }
 0x4aa   : > { %1968 = vadd.xlane.f32.xlu0 %v1967_v25 }
 0x4ae   : > { %2191 = vadd.xlane.f32.xlu0 %v2190_v27 }
 0x4b3   : > { %2197 = vrot.lane.b32.xlu1 %v4021_v2, %s3599_s3  ;;  %s4316_s3 = sld [smem:[#allocation23_spill]] }
 0x4b7   : > { %3445 = vrot.lane.b32.xlu1 %v3444_v19, %s3600_s4 }
 0x4b9   : > { %s4317_s23 = scalar_lea.vmem %s4316_s3, %s3750_s1 }
 0x4bb   : > { %3450 = vrot.lane.b32.xlu1 %v3449_v32, %s3601_s7 }
 0x4c4   : > { %2086 = vrot.lane.b32.xlu0 %v4021_v2, %s3598_s11  ;;  %s4314_s11 = scalar_lea.vmem %s4250_s12, %s3750_s1 }
 0x4ea   : > { %v1507_v35 = vpop.xlane.xlu1 %1506 }
 0x4eb   : > { %3504 = vrcp.f32 %v1507_v35 }
 0x4f2   : > { %v1619_v15 = vpop.xlane.xlu0 %1618 }
 0x4f3   : > { %3506 = vrcp.f32 %v1619_v15 }
 0x4f5   : > { %v3505_v19 = vpop.eup %3504 }
 0x4f6   : > { %v1510_v36 = vmul.f32 %v3505_v19, %v4003_v50 }
 0x4f8   : > { %v1511_v37 = vpack.c.bf16 %v1510_v36, %v1510_v36 }
 0x4fa   : > { %3273 = vmatmul.mubr.msk.bf16.vlgmr.msra.gmra.mrb[4].mxu0 %vm1342_vm7, %v1511_v37  ;;  %v1730_v39 = vpop.xlane.xlu1 %1729 }
 0x4fb   : > { %3283 = vmatpush3.bf16.msra.mxu0 %v1630_v38  ;;  %3508 = vrcp.f32 %v1730_v39  ;;  %3284 = vmatprep.mubr.msk.bf16.mxu0 %vm3596_vm2, %v3595_v21 }
 0x4fc   : > { %3294 = vmatprep.subr.bf16.mxu0 %v3595_v21 }
 0x4fd   : > { %v3507_v40 = vpop.eup %3506 }
 0x4fe   : > { %v1622_v41 = vmul.f32 %v3507_v40, %v4007_v56  ;;  %v1976_v52 = vpop.permute.xlu1 %1975 }
 0x4ff   : > { %v1981_v55 = vsel %vm1405_vm8, %v1976_v52, 0 }
 0x500   : > { %v1623_v42 = vpack.c.bf16 %v1622_v41, %v1622_v41 }
 0x502   : > { %v1860_v43 = vpop.xlane.xlu0 %1859  ;;  %3285 = vmatmul.mubr.msk.bf16.vlgmr.msra.gmra.mrb[8].mxu0 %vm1342_vm7, %v1623_v42 }
 0x503   : > { %3510 = vrcp.f32 %v1860_v43  ;;  %3296 = vmatprep.mubr.msk.bf16.mxu0 %vm3596_vm2, %v3595_v21 }
 0x505   : > { %v3509_v44 = vpop.eup %3508 }
 0x506   : > { %v1733_v45 = vmul.f32 %v3509_v44, %v4011_v60  ;;  %v1736_v46 = vpop.permute.xlu0 %1735  ;;  %v3466_v44 = vld [vmem:[%s3796_s27] sm:$0xff]  }
 0x507   : > { %v1741_v47 = vsel %vm1405_vm8, %v1736_v46, 0 }
 0x508   : > { %3295 = vmatpush3.bf16.msra.mxu0 %v1741_v47  ;;  %v1734_v48 = vpack.c.bf16 %v1733_v45, %v1733_v45 }
 0x509   : > { %3306 = vmatprep.subr.bf16.mxu0 %v3595_v21 }
 0x50b   : > { %3297 = vmatmul.mubr.msk.bf16.vlgmr.msra.gmra.mrb[12].mxu0 %vm1342_vm7, %v1734_v48 }
 0x50c   : > { %3307 = vmatpush3.bf16.msra.mxu0 %v1869_v49  ;;  %3308 = vmatprep.mubr.msk.bf16.mxu0 %vm3596_vm2, %v3595_v21 }
 0x50d   : > { %v3511_v50 = vpop.eup %3510  ;;  %3318 = vmatprep.subr.bf16.mxu0 %v3595_v21 }
 0x50e   : > { %v1863_v51 = vmul.f32 %v3511_v50, %v4015_v62  ;;  %v2262_v62 = vld [vmem:[#allocation3 + $0x7] sm:$0xff]  ;;  %v3467_v50 = vld [vmem:[%s3796_s27 + $0x8] sm:$0xff]  }
 0x510   : > { %v1864_v53 = vpack.c.bf16 %v1863_v51, %v1863_v51 }
 0x513   : > { %3309 = vmatmul.mubr.msk.bf16.vlgmr.msra.gmra.mrb[16].mxu0 %vm1342_vm7, %v1864_v53 }
 0x514   : > { %3319 = vmatpush3.bf16.msra.mxu0 %v1981_v55  ;;  %3320 = vmatprep.mubr.msk.bf16.mxu0 %vm3596_vm2, %v3595_v21 }
 0x515   : > { %3330 = vmatprep.subr.bf16.mxu0 %v3595_v21 }
 0x52f   : > { %v2081_v56 = vpop.xlane.xlu1 %2080 }
 0x533   : > { %v2198_v57 = vpop.permute.xlu1 %2197 }
 0x534   : > { %v2203_v14 = vsel %vm1405_vm8, %v2198_v57, 0 }
 0x537   : > { %v1969_v54 = vpop.xlane.xlu0 %1968  ;;  %v3446_v58 = vpop.permute.xlu1 %3445 }
 0x538   : > { %3512 = vrcp.f32 %v1969_v54  ;;  %v3448_v59 = vunpack.i.h.bf16 %v3446_v58  ;;  %v3447_v60 = vunpack.i.l.bf16 %v3446_v58 }
 0x539   : > { %3514 = vrcp.f32 %v2081_v56 }
 0x53a   : > { %v2283_v2 = vsel %vm1057_vm1, %v2263_v63, %v3448_v59  ;;  %v2282_v3 = vsel %vm1057_vm1, %v2262_v62, %v3447_v60 }
 0x53b   : > { %v3451_v61 = vpop.permute.xlu1 %3450  ;;  %v2192_v4 = vpop.xlane.xlu0 %2191 }
 0x53c   : > { %v3453_v0 = vunpack.i.h.bf16 %v3451_v61  ;;  %v3452_v1 = vunpack.i.l.bf16 %v3451_v61  ;;  %3516 = vrcp.f32 %v2192_v4  ;;  %v3114_v61 = vld [vmem:[%s4314_s11] ss:$0 sm:$0xff] }
 0x53e   : > { %v2285_v5 = vsel %vm2284_vm11, %v2282_v3, %v3452_v1  ;;  %v2286_v6 = vsel %vm2284_vm11, %v2283_v2, %v3453_v0 }
 0x53f   : > { %v3163_v7 = vpack.c.bf16 %v2286_v6, %v2285_v5  ;;  %v2087_v11 = vpop.permute.xlu0 %2086 }
 0x540   : > { %v2092_v16 = vsel %vm1405_vm8, %v2087_v11, 0 }
 0x541   : > { %3361 = vmatmul.mubr.msk.bf16.vlgmr.msra.gmra.mrb[44].mxu1 %vm2349_vm12, %v3163_v7 }
 0x542   : > { %v3513_v8 = vpop.eup %3512 }
 0x543   : > { %v1972_v9 = vmul.f32 %v3513_v8, %v4043_v24  ;;  %v3515_v13 = vpop.eup %3514 }
 0x544   : > { %v2084_v17 = vmul.f32 %v3515_v13, %v4039_v22 }
 0x545   : > { %v1973_v12 = vpack.c.bf16 %v1972_v9, %v1972_v9 }
 0x546   : > { %v2085_v18 = vpack.c.bf16 %v2084_v17, %v2084_v17  ;;  %v3517_v20 = vpop.eup %3516 }
 0x547   : > { %3321 = vmatmul.mubr.msk.bf16.vlgmr.msra.gmra.mrb[20].mxu0 %vm1342_vm7, %v1973_v12  ;;  %v2195_v23 = vmul.f32 %v3517_v20, %v4047_v26 }
 0x548   : > { %3331 = vmatpush3.bf16.msra.mxu0 %v2092_v16  ;;  %3332 = vmatprep.mubr.msk.bf16.mxu0 %vm3596_vm2, %v3595_v21  ;;  %v3123_v16 = vld [vmem:[%s4315_s21] ss:$0 sm:$0xff] }
 0x549   : > { %3342 = vmatprep.subr.bf16.mxu0 %v3595_v21  ;;  %v2196_v24 = vpack.c.bf16 %v2195_v23, %v2195_v23  ;;  %v3530_v23 = vld [vmem:[#allocation2] sm:$0xff] }
 0x54f   : > { %3333 = vmatmul.mubr.msk.bf16.vlgmr.msra.gmra.mrb[24].mxu0 %vm1342_vm7, %v2085_v18 }
 0x550   : > { %3343 = vmatpush3.bf16.msra.mxu0 %v2203_v14  ;;  %3344 = vmatprep.mubr.msk.bf16.mxu0 %vm3596_vm2, %v3595_v21 }
 0x551   : > { %3364 = vmatprep.subr.bf16.mxu0 %v3595_v21 }
 0x557   : > { %3345 = vmatmul.mubr.msk.bf16.vlgmr.msra.gmra.mrb[28].mxu0 %vm1342_vm7, %v2196_v24 }
 0x558   : > { %3368 = vmatprep.mubr.msk.bf16.mxu0 %vm3596_vm2, %v3595_v21  ;;  %3365 = vmatpush3.bf16.msra.mxu0 %v3466_v44 }
 0x559   : > { %3366 = vmatprep.subr.bf16.mxu0 %v3595_v21 }
 0x55b   : > { %v1443_v22 = vpop.f32.mrb[0].mxu0 }
 0x55c   : > { %v3262_v25 = vpop.f32.mrb[1].mxu0  ;;  %3367 = vmatpush3.bf16.msra.mxu0 %v3467_v50 }
 0x55d   : > { %v1446_v27 = vpop.f32.mrb[2].mxu0  ;;  %3372 = vmatprep.subr.bf16.mxu0 %v3595_v21 }
 0x55e   : > { %v3263_v28 = vpop.f32.mrb[3].mxu0  ;;  %v3531_v27 = vld [vmem:[#allocation2 + $0x8] sm:$0xff] }
 0x5cd   : > { %v1555_v29 = vpop.f32.mrb[4].mxu0 }
 0x5ce   : > { %1784 = vrot.lane.b32.xlu1 %v1555_v29, %s3602_s19  ;;  %v3274_v30 = vpop.f32.mrb[5].mxu0 }
 0x5cf   : > { %v1558_v31 = vpop.f32.mrb[6].mxu0 }
 0x5d0   : > { %v3275_v32 = vpop.f32.mrb[7].mxu0 }
 0x5d5   : > { %v1666_v26 = vpop.f32.mrb[8].mxu0 }
 0x5d6   : > { %1788 = vrot.lane.b32.xlu0 %v1666_v26, %s3603_s25  ;;  %v3286_v33 = vpop.f32.mrb[9].mxu0 }
 0x5d7   : > { %v1669_v34 = vpop.f32.mrb[10].mxu0 }
 0x5d8   : > { %v3287_v35 = vpop.f32.mrb[11].mxu0 }
 0x5de   : > { %v1777_v10 = vpop.f32.mrb[12].mxu0 }
 0x5df   : > { %1792 = vrot.lane.b32.xlu0 %v1777_v10, %s3604_s30  ;;  %v3298_v15 = vpop.f32.mrb[13].mxu0 }
 0x5e0   : > { %v1780_v19 = vpop.f32.mrb[14].mxu0 }
 0x5e1   : > { %v3299_v36 = vpop.f32.mrb[15].mxu0 }
 0x5e6   : > { %v1905_v37 = vpop.f32.mrb[16].mxu0 }
 0x5e7   : > { %v3310_v38 = vpop.f32.mrb[17].mxu0 }
 0x5e8   : > { %v1908_v39 = vpop.f32.mrb[18].mxu0  ;;  %v3469_v38 = vld [vmem:[%s3818_s13 + $0x8] sm:$0xff]  }
 0x5e9   : > { %v3311_v40 = vpop.f32.mrb[19].mxu0 }
 0x614   : > { %v2387_v41 = vpop.f32.mrb[44].mxu1 }
 0x615   : > { %v3362_v42 = vpop.f32.mrb[45].mxu1  ;;  %v2388_v63 = vadd.f32 %v3114_v61, %v2387_v41 }
 0x616   : > { %v2390_v43 = vpop.f32.mrb[46].mxu1 }
 0x617   : > { %v3363_v45 = vpop.f32.mrb[47].mxu1  ;;  %v2391_v7 = vadd.f32 %v3114_v61, %v2390_v43  ;;  %v3128_v61 = vld [vmem:[%s4318_s0] ss:$0 sm:$0xff] }
 0x61a   : > { %v2017_v46 = vpop.f32.mrb[20].mxu0 }
 0x61b   : > { %2246 = vrot.lane.b32.xlu1 %v2017_v46, %s3602_s19  ;;  %v3322_v47 = vpop.f32.mrb[21].mxu0 }
 0x61c   : > { %v2020_v48 = vpop.f32.mrb[22].mxu0 }
 0x61d   : > { %v3323_v49 = vpop.f32.mrb[23].mxu0 }
 0x622   : > { %v2128_v51 = vpop.f32.mrb[24].mxu0 }
 0x623   : > { %2250 = vrot.lane.b32.xlu1 %v2128_v51, %s3603_s25  ;;  %v3334_v52 = vpop.f32.mrb[25].mxu0  ;;  %s4319_s25 = scalar_lea.vmem %s4256_s18, %s3750_s1 }
 0x624   : > { %v2131_v53 = vpop.f32.mrb[26].mxu0 }
 0x625   : > { %v3335_v55 = vpop.f32.mrb[27].mxu0 }
 0x62a   : > { %v2239_v56 = vpop.f32.mrb[28].mxu0 }
 0x62b   : > { %2254 = vrot.lane.b32.xlu1 %v2239_v56, %s3604_s30  ;;  %v3346_v57 = vpop.f32.mrb[29].mxu0 }
 0x62c   : > { %v2242_v54 = vpop.f32.mrb[30].mxu0 }
 0x62d   : > { %v3347_v58 = vpop.f32.mrb[31].mxu0  ;;  %v3127_v54 = vld [vmem:[%s4317_s23] ss:$0 sm:$0xff] }
 0x640   : > { %v1785_v59 = vpop.permute.xlu1 %1784 }
 0x641   : > { %v1795_v62 = vsel %vm1342_vm7, %v1443_v22, %v1785_v59 }
 0x648   : > { %v1789_v60 = vpop.permute.xlu0 %1788 }
 0x649   : > { %v1797_v0 = vsel %vm1796_vm13, %v1795_v62, %v1789_v60 }
 0x651   : > { %v1793_v1 = vpop.permute.xlu0 %1792 }
 0x652   : > { %v1799_v2 = vsel %vm1798_vm14, %v1797_v0, %v1793_v1  ;;  %v3470_v1 = vld [vmem:[%s3832_s15] sm:$0xff]  }
 0x653   : > { %v2394_v3 = vadd.f32 %v2388_v63, %v1799_v2 }
 0x68d   : > { %v2247_v4 = vpop.permute.xlu1 %2246 }
 0x68e   : > { %v2257_v6 = vsel %vm1342_vm7, %v1905_v37, %v2247_v4  ;;  %v3468_v37 = vld [vmem:[%s3818_s13] sm:$0xff]   ;;  %v3472_v4 = vld [vmem:[%s3832_s15 + $0x10] sm:$0xff]  }
 0x695   : > { %v2251_v5 = vpop.permute.xlu1 %2250 }
 0x696   : > { %v2258_v8 = vsel %vm1796_vm13, %v2257_v6, %v2251_v5  ;;  %v3473_v5 = vld [vmem:[%s3832_s15 + $0x18] sm:$0xff]   ;;  %v3474_v6 = vld [vmem:[%s3832_s15 + $0x20] sm:$0xff]  }
 0x69d   : > { %v2255_v9 = vpop.permute.xlu1 %2254 }
 0x69e   : > { %v2259_v11 = vsel %vm1798_vm14, %v2258_v8, %v2255_v9  ;;  %v3476_v8 = vld [vmem:[%s3832_s15 + $0x30] sm:$0xff]   ;;  %v3477_v9 = vld [vmem:[%s3832_s15 + $0x38] sm:$0xff]  }
 0x69f   : > { %v2395_v12 = vadd.f32 %v2391_v7, %v2259_v11  ;;  %v3475_v7 = vld [vmem:[%s3832_s15 + $0x28] sm:$0xff]   ;;  %v3129_v11 = vld [vmem:[%s4319_s25] ss:$0 sm:$0xff] }
 0x6a1   : > { %v2396_v13 = vpack.c.bf16 %v2395_v12, %v2394_v3  ;;  %v3471_v3 = vld [vmem:[%s3832_s15 + $0x8] sm:$0xff]  }
 0x6a3   : > { %3369 = vmatmul.mubr.msk.bf16.vlgmr.msra.gmra.mrb[32].mxu0 %vm1057_vm1, %v2396_v13 }
 0x6a4   : > { %3376 = vmatprep.mubr.msk.bf16.mxu0 %vm3596_vm2, %v3595_v21  ;;  %3373 = vmatpush3.bf16.msra.mxu0 %v3468_v37 }
 0x6a5   : > { %3374 = vmatprep.subr.bf16.mxu0 %v3595_v21 }
 0x6a8   : > { %3375 = vmatpush3.bf16.msra.mxu0 %v3469_v38 }
 0x6a9   : > { %3380 = vmatprep.subr.bf16.mxu0 %v3595_v21 }
 0x776   : > { %v2457_v17 = vpop.f32.mrb[32].mxu0 }
 0x777   : > { %v2458_v18 = vadd.f32 %v3123_v16, %v2457_v17  ;;  %v3370_v20 = vpop.f32.mrb[33].mxu0 }
 0x778   : > { %v2460_v14 = vpop.f32.mrb[34].mxu0 }
 0x779   : > { %v4129_v24 = vadd.f32 %v3530_v23, %v2458_v18  ;;  %v2461_v22 = vadd.f32 %v3123_v16, %v2460_v14  ;;  %v3371_v25 = vpop.f32.mrb[35].mxu0 }
 0x77b   : > { %v4131_v28 = vadd.f32 %v3531_v27, %v2461_v22  ;;  %v2468_v29 = vsel %vm1057_vm1, %v4129_v24, 0.0 }
 0x77c   : > { %2469 = vadd.xlane.f32.xlu0 %v2468_v29 }
 0x77d   : > { %v2471_v30 = vsel %vm1057_vm1, %v4131_v28, 0.0 }
 0x77e   : > { %2472 = vadd.xlane.f32.xlu1 %v2471_v30 }
 0x809   : > { %v2470_v31 = vpop.xlane.xlu0 %2469 }
 0x80a   : > { %v2474_v32 = vmul.f32 0.03125, %v2470_v31 }
 0x80b   : > { %v2473_v26 = vpop.xlane.xlu1 %2472 }
 0x80c   : > { %v2476_v33 = vsub.f32 %v4129_v24, %v2474_v32  ;;  %v2475_v34 = vmul.f32 0.03125, %v2473_v26 }
 0x80e   : > { %v2477_v35 = vsub.f32 %v4131_v28, %v2475_v34  ;;  %v2478_v10 = vmul.f32 %v2476_v33, %v2476_v33 }
 0x810   : > { %v2480_v15 = vsel %vm1057_vm1, %v2478_v10, 0.0  ;;  %v2479_v19 = vmul.f32 %v2477_v35, %v2477_v35 }
 0x811   : > { %2481 = vadd.xlane.f32.xlu0 %v2480_v15  ;;  %v3136_v15 = vld [vmem:[%s1028_s5] ss:$0 sm:$0xff] }
 0x812   : > { %v2483_v36 = vsel %vm1057_vm1, %v2479_v19, 0.0 }
 0x815   : > { %2484 = vadd.xlane.f32.xlu0 %v2483_v36 }
 0x89e   : > { %v2482_v39 = vpop.xlane.xlu0 %2481 }
 0x89f   : > { %v2486_v40 = vmul.f32 0.032258064, %v2482_v39 }
 0x8a1   : > { %3518 = vrsqrt.f32 %v2486_v40  ;;  %vm2490_vm15 = vcmp.eq.f32.partialorder %v2486_v40, inf  ;;  %v2493_v45 = vand.u32 2147483648, %v2486_v40  ;;  %vm2492_vm0 = vcmp.eq.f32.partialorder %v2486_v40, 0.0 }
 0x8a2   : > { %v2485_v41 = vpop.xlane.xlu0 %2484 }
 0x8a3   : > { %v2487_v42 = vmul.f32 0.032258064, %v2485_v41 }
 0x8a5   : > { %3520 = vrsqrt.f32 %v2487_v42  ;;  %vm2497_vm3 = vcmp.eq.f32.partialorder %v2487_v42, inf  ;;  %v2500_v51 = vand.u32 2147483648, %v2487_v42  ;;  %vm2499_vm4 = vcmp.eq.f32.partialorder %v2487_v42, 0.0 }
 0x8ab   : > { %v3519_v43 = vpop.eup %3518 }
 0x8ac   : > { %v2489_v44 = vmul.f32 %v3519_v43, %v2486_v40 }
 0x8ae   : > { %v2491_v46 = vsel %vm2490_vm15, %v2486_v40, %v2489_v44 }
 0x8af   : > { %v3521_v47 = vpop.eup %3520  ;;  %v2494_v48 = vsel %vm2492_vm0, %v2493_v45, %v2491_v46 }
 0x8b0   : > { %v2502_v49 = vadd.f32 1e-06, %v2494_v48  ;;  %v2496_v50 = vmul.f32 %v3521_v47, %v2487_v42 }
 0x8b2   : > { %3522 = vrcp.f32 %v2502_v49  ;;  %v2498_v52 = vsel %vm2497_vm3, %v2487_v42, %v2496_v50 }
 0x8b3   : > { %v2501_v53 = vsel %vm2499_vm4, %v2500_v51, %v2498_v52 }
 0x8b4   : > { %v2503_v55 = vadd.f32 1e-06, %v2501_v53 }
 0x8b6   : > { %3524 = vrcp.f32 %v2503_v55 }
 0x8bc   : > { %v3523_v56 = vpop.eup %3522 }
 0x8bd   : > { %v2508_v57 = vmul.f32 %v3523_v56, %v2476_v33 }
 0x8bf   : > { %v2516_v60 = vmul.f32 %v3127_v54, %v2508_v57 }
 0x8c0   : > { %v3525_v58 = vpop.eup %3524 }
 0x8c1   : > { %v2509_v59 = vmul.f32 %v3525_v58, %v2477_v35  ;;  %v2524_v63 = vadd.f32 %v3128_v61, %v2516_v60 }
 0x8c3   : > { %v2517_v62 = vmul.f32 %v3127_v54, %v2509_v59 }
 0x8c5   : > { %v2525_v0 = vadd.f32 %v3128_v61, %v2517_v62 }
 0x8c7   : > { %v3164_v2 = vpack.c.bf16 %v2525_v0, %v2524_v63 }
 0x8c9   : > { %3377 = vmatmul.mubr.msk.bf16.vlgmr.msra.gmra.mrb[36].mxu0 %vm1057_vm1, %v3164_v2 }
 0x8ca   : > { %3381 = vmatpush3.bf16.msra.mxu0 %v3470_v1  ;;  %3396 = vmatprep.mubr.msk.bf16.mxu0 %vm3596_vm2, %v3595_v21 }
 0x8cb   : > { %3382 = vmatprep.subr.bf16.mxu0 %v3595_v21 }
 0x8ce   : > { %3383 = vmatpush3.bf16.msra.mxu0 %v3471_v3 }
 0x8cf   : > { %3384 = vmatprep.subr.bf16.mxu0 %v3595_v21 }
 0x8d2   : > { %3385 = vmatpush3.bf16.msra.mxu0 %v3472_v4 }
 0x8d3   : > { %3386 = vmatprep.subr.bf16.mxu0 %v3595_v21 }
 0x8d6   : > { %3387 = vmatpush3.bf16.msra.mxu0 %v3473_v5 }
 0x8d7   : > { %3388 = vmatprep.subr.bf16.mxu0 %v3595_v21 }
 0x8da   : > { %3389 = vmatpush3.bf16.msra.mxu0 %v3474_v6  ;;  %v3146_v6 = vld [vmem:[%s4321_s9] ss:$0 sm:$0xff] (!%p3145_p6) }
 0x8db   : > { %3390 = vmatprep.subr.bf16.mxu0 %v3595_v21 }
 0x8de   : > { %3391 = vmatpush3.bf16.msra.mxu0 %v3475_v7 }
 0x8df   : > { %3392 = vmatprep.subr.bf16.mxu0 %v3595_v21 }
 0x8e2   : > { %3393 = vmatpush3.bf16.msra.mxu0 %v3476_v8  ;;  %v3147_v8 = vld [vmem:[%s4322_s22] ss:$0 sm:$0xff] (!%p3145_p6) }
 0x8e3   : > { %3394 = vmatprep.subr.bf16.mxu0 %v3595_v21 }
 0x8e6   : > { %3395 = vmatpush3.bf16.msra.mxu0 %v3477_v9 }
 0x99c   : > { %v2593_v12 = vpop.f32.mrb[36].mxu0 }
 0x99d   : > { %v2594_v13 = vadd.f32 %v3129_v11, %v2593_v12  ;;  %v3378_v16 = vpop.f32.mrb[37].mxu0 }
 0x99e   : > { %v2596_v17 = vpop.f32.mrb[38].mxu0 }
 0x99f   : > { %v2600_v18 = vmin.f32 %v2594_v13, 0.0  ;;  %v2597_v20 = vadd.f32 %v3129_v11, %v2596_v17  ;;  %v3379_v14 = vpop.f32.mrb[39].mxu0  ;;  %vm2608_vm2 = vcmp.gt.f32.partialorder %v2594_v13, 0.0 }
 0x9a1   : > { %v2602_v23 = vmul.f32 1.442695, %v2600_v18  ;;  %v2601_v22 = vmin.f32 %v2597_v20, 0.0  ;;  %vm2609_vm5 = vcmp.gt.f32.partialorder %v2597_v20, 0.0 }
 0x9a3   : > { %3526 = vpow2.f32 %v2602_v23  ;;  %v2604_v25 = vmul.f32 1.442695, %v2601_v22 }
 0x9a5   : > { %3528 = vpow2.f32 %v2604_v25 }
 0x9ad   : > { %v3527_v21 = vpop.eup %3526 }
 0x9ae   : > { %v3134_v27 = vadd.f32 -1.0, %v3527_v21 }
 0x9af   : > { %v3529_v29 = vpop.eup %3528 }
 0x9b0   : > { %v2610_v30 = vmul.f32 1.6732632, %v3134_v27  ;;  %v3135_v31 = vadd.f32 -1.0, %v3529_v29 }
 0x9b2   : > { %v2612_v32 = vsel %vm2608_vm2, %v2594_v13, %v2610_v30  ;;  %v2611_v26 = vmul.f32 1.6732632, %v3135_v31 }
 0x9b3   : > { %v2614_v34 = vmul.f32 1.050701, %v2612_v32 }
 0x9b4   : > { %v2613_v33 = vsel %vm2609_vm5, %v2597_v20, %v2611_v26 }
 0x9b5   : > { %v2615_v35 = vmul.f32 1.050701, %v2613_v33 }
 0x9b7   : > { %v2616_v10 = vpack.c.bf16 %v2615_v35, %v2614_v34 }
 0x9b9   : > { %3397 = vmatmul.mubr.bf16.vlgmr.msra.gmra.mrb[40].mxu0 %v2616_v10 }
 0xa8c   : > { %v2722_v19 = vpop.f32.mrb[40].mxu0 }
 0xa8d   : > { %v2723_v36 = vadd.f32 %v3136_v15, %v2722_v19  ;;  %v3398_v37 = vpop.f32.mrb[41].mxu0  ;;  %2736 = sbr.rel (%p3145_p6) target bundleno = 3038 (0xbde), region = 120 }
 0xa8e   : > { %v2725_v38 = vpop.f32.mrb[42].mxu0 }
 0xa8f   : > { %v2729_v39 = vadd.f32 %v2723_v36, %v4129_v24  ;;  %v2726_v40 = vadd.f32 %v3136_v15, %v2725_v38  ;;  %v3399_v41 = vpop.f32.mrb[43].mxu0 }
 0xa91   : > { %2731 = vst.msk [vmem:[#allocation2] sm:$0xff] %vm1057_vm1, %v2729_v39  ;;  %v2730_v42 = vadd.f32 %v2726_v40, %v4131_v28  ;;  %v2739_v43 = vsel (!%p3145_p6), %vm1057_vm1, %v2729_v39, 0.0 }
 0xa92   : > { %2740 = vadd.xlane.f32.xlu0 (!%p3145_p6), %v2739_v43 }
 0xa93   : > { %2732 = vst.msk [vmem:[#allocation2 + $0x8] sm:$0xff] %vm1057_vm1, %v2730_v42  ;;  %v2742_v44 = vsel (!%p3145_p6), %vm1057_vm1, %v2730_v42, 0.0 }
 0xa96   : > { %2743 = vadd.xlane.f32.xlu0 %v2742_v44 }
 0xb1f   : > { %v2741_v45 = vpop.xlane.xlu0 %2740 }
 0xb20   : > { %v2745_v46 = vmul.f32 0.03125, %v2741_v45 }
 0xb22   : > { %v2747_v24 = vsub.f32 %v2729_v39, %v2745_v46 }
 0xb23   : > { %v2744_v47 = vpop.xlane.xlu0 %2743 }
 0xb24   : > { %v2746_v48 = vmul.f32 0.03125, %v2744_v47  ;;  %v2749_v49 = vmul.f32 %v2747_v24, %v2747_v24 }
 0xb26   : > { %v2748_v50 = vsub.f32 %v2730_v42, %v2746_v48  ;;  %v2751_v28 = vsel %vm1057_vm1, %v2749_v49, 0.0 }
 0xb27   : > { %2752 = vadd.xlane.f32.xlu1 %v2751_v28 }
 0xb28   : > { %v2750_v51 = vmul.f32 %v2748_v50, %v2748_v50 }
 0xb2a   : > { %v2754_v52 = vsel %vm1057_vm1, %v2750_v51, 0.0 }
 0xb2b   : > { %2755 = vadd.xlane.f32.xlu1 %v2754_v52 }
 0xbb4   : > { %v2753_v53 = vpop.xlane.xlu1 %2752 }
 0xbb5   : > { %v2757_v55 = vmul.f32 0.032258064, %v2753_v53 }
 0xbb7   : > { %3532 = vrsqrt.f32 %v2757_v55  ;;  %vm2761_vm6 = vcmp.eq.f32.partialorder %v2757_v55, inf  ;;  %v2764_v59 = vand.u32 2147483648, %v2757_v55  ;;  %vm2763_vm7 = vcmp.eq.f32.partialorder %v2757_v55, 0.0 }
 0xbb8   : > { %v2756_v56 = vpop.xlane.xlu1 %2755 }
 0xbb9   : > { %v2758_v57 = vmul.f32 0.032258064, %v2756_v56 }
 0xbbb   : > { %3534 = vrsqrt.f32 %v2758_v57  ;;  %vm2768_vm8 = vcmp.eq.f32.partialorder %v2758_v57, inf  ;;  %v2771_v1 = vand.u32 2147483648, %v2758_v57  ;;  %vm2770_vm9 = vcmp.eq.f32.partialorder %v2758_v57, 0.0 }
 0xbc1   : > { %v3533_v54 = vpop.eup %3532 }
 0xbc2   : > { %v2760_v58 = vmul.f32 %v3533_v54, %v2757_v55 }
 0xbc4   : > { %v2762_v60 = vsel %vm2761_vm6, %v2757_v55, %v2760_v58 }
 0xbc5   : > { %v3535_v61 = vpop.eup %3534  ;;  %v2765_v62 = vsel %vm2763_vm7, %v2764_v59, %v2762_v60 }
 0xbc6   : > { %v2773_v63 = vadd.f32 1e-06, %v2765_v62  ;;  %v2767_v0 = vmul.f32 %v3535_v61, %v2758_v57 }
 0xbc8   : > { %3536 = vrcp.f32 %v2773_v63  ;;  %v2769_v2 = vsel %vm2768_vm8, %v2758_v57, %v2767_v0 }
 0xbc9   : > { %v2772_v3 = vsel %vm2770_vm9, %v2771_v1, %v2769_v2 }
 0xbca   : > { %v2774_v4 = vadd.f32 1e-06, %v2772_v3 }
 0xbcc   : > { %3538 = vrcp.f32 %v2774_v4 }
 0xbd2   : > { %v3537_v5 = vpop.eup %3536 }
 0xbd3   : > { %v2779_v7 = vmul.f32 %v3537_v5, %v2747_v24 }
 0xbd5   : > { %v2787_v9 = vmul.f32 %v3146_v6, %v2779_v7 }
 0xbd6   : > { %v3539_v11 = vpop.eup %3538 }
 0xbd7   : > { %v2795_v12 = vadd.f32 %v3147_v8, %v2787_v9  ;;  %v2780_v13 = vmul.f32 %v3539_v11, %v2748_v50 }
 0xbd9   : > { %2797 = vst.msk [vmem:[#allocation4] sm:$0xff] %vm1057_vm1, %v2795_v12  ;;  %v2788_v16 = vmul.f32 %v3146_v6, %v2780_v13 }
 0xbdb   : > { %v2796_v17 = vadd.f32 %v3147_v8, %v2788_v16 }
 0xbdd   : > { %2798 = vst.msk [vmem:[#allocation4 + $0x8] sm:$0xff] %vm1057_vm1, %v2796_v17 }
 0xbde PF: > { %s4323_s21 = sld [smem:[#allocation9_spill]]  ;;  %s3605_s3 = smov [#allocation4]  }
 0xbdf   : > { %s2808_s23 = sshll.u32 %s3605_s3, 4  ;;  %s2809_s23 = int_to_ptr.vmem [resolvable:$true] %s2808_s23 }
 0xbe0   : > { %s3540_s26 = scalar_lea.vmem %s2809_s23, 256  ;;  %p3547_p11 = scmp.lt.s32.totalorder %s2809_s23, %s2809_s23 }
 0xbe1   : > { %p3541_p8 = scmp.ne.s32.totalorder %s2809_s23, %s3540_s26  ;;  %p3548_p12 = scmp.lt.s32.totalorder %s3540_s26, %s3540_s26 }
 0xbe3   : > { %p3549_p13 = por %p3548_p12, %p3547_p11 }
 0xbe4   : > { %s4324_s13 = sadd.s32 4294967295, %s4323_s21  }
 0xbe5   : > { %p4202_p7 = scmp.eq.s32.totalorder %s4324_s13, 1 }
 0xbe7   : > { %p3542_p9 = pnand %p3541_p8, %p4202_p7 }
 0xbe9   : > { %p3543_p10 = pneg %p3542_p9 }
 0xbeb   : > { %p3550_p0 = pnand %p3549_p13, %p3543_p10 }
 0xbed   : > { %3553 = shalt.err (!%p3550_p0)
}
 0xbee   : > { %s4326_s4 = sld [smem:[#allocation27_spill]] }
 0xbf4   : > { %s4327_s7 = smov %s4326_s4  ;;  %s3554_s25 = scalar_lea.hbm %s4326_s4, 256 }
 0xbf5   : > { %p3555_p1 = scmp.ne.s32.totalorder %s4327_s7, %s3554_s25  ;;  %p3560_p4 = scmp.lt.u32.totalorder %s3554_s25, %s4327_s7 }
 0xbf7   : > { %p3556_p2 = pnand %p3555_p1, %p4202_p7 }
 0xbf9   : > { %p3557_p3 = pneg %p3556_p2 }
 0xbfb   : > { %p3562_p5 = pnand %p3560_p4, %p3557_p3 }
 0xbfd   : > { %3565 = shalt.err (!%p3562_p5)
}
 0xbfe   : > { %s3606_s5 = smov 128  }
 0xbff   : > { %3402 = dma.vmem_to_hbm [thread:$0]  (%p4202_p7), %s2809_s23, 256, %s4327_s7, [#allocation5], %s3606_s5, %s3606_s5, %s3602_s19  }
 0xc00   : > { %3579 = dma.done.wait (%p4202_p7), [#allocation5], 256  }
 0xc01   : > { %3581 = vsyncadd (%p4202_p7), [#allocation5], 4294967040 }
 0xc02 PF: > { %s4328_s27 = sld [smem:[#allocation9_spill]]  ;;  %s4329_s4 = sld [smem:[#allocation8_spill]] }
 0xc03   : > { %s4330_s30 = sld [smem:[#allocation10_spill]] }
 0xc08   : > { %s34_s24 = sadd.s32 1, %s4328_s27  }
 0xc09   : > { %p31_p6 = scmp.ge.s32.totalorder %s34_s24, 4  }
 0xc0b   :  { %33 = sbr.rel (!%p31_p6) target bundleno = 19 (0x13), region = 205 }
 0xc12   :  { %2824 = vsyncpa [#allocation5], 1 }
 0xc13   :  { %2826 = vsyncpa [#allocation5 + $0x1], 1 }

</bundles_post_ra>
